<compile_context>
chip_gen: v6e
topology: v6e:2x2x1
jax: 0.10.0
libtpu: 0.0.40
codegen_flags: <defaults>
</compile_context>

<pallas_src>
import functools
import math

import jax
import jax.numpy as jnp
from jax.experimental import pallas as pl
from jax.experimental.pallas import tpu as pltpu

LN_EPS = 1e-5
NEG_INF = -1e9


def _row_tile(m, target=256):
    """Largest row tile <= target that evenly divides m (exact grid)."""
    if m <= target:
        return m
    if m % target == 0:
        return target
    for bm in range(target, 0, -1):
        if m % bm == 0:
            return bm
    return m


# --------------------------- Pallas kernels --------------------------------

def _linear_kernel(x_ref, w_ref, b_ref, o_ref):
    x = x_ref[...].astype(jnp.bfloat16)          # bf16 MXU operands
    o_ref[...] = (
        jnp.dot(x, w_ref[...], preferred_element_type=jnp.float32) + b_ref[...]
    )


def linear(x2d, w_bf16, b):
    """y = x @ W + b.   x2d [M,Din] f32, W [Din,Dout] bf16, b [Dout] f32."""
    M, d_in = x2d.shape
    d_out = w_bf16.shape[1]
    bm = _row_tile(M)
    return pl.pallas_call(
        _linear_kernel,
        out_shape=jax.ShapeDtypeStruct((M, d_out), jnp.float32),
        grid=(M // bm,),
        in_specs=[
            pl.BlockSpec((bm, d_in), lambda i: (i, 0)),
            pl.BlockSpec((d_in, d_out), lambda i: (0, 0)),
            pl.BlockSpec((1, d_out), lambda i: (0, 0)),
        ],
        out_specs=pl.BlockSpec((bm, d_out), lambda i: (i, 0)),
        compiler_params=pltpu.CompilerParams(
            dimension_semantics=("parallel",)),
    )(x2d, w_bf16, b.reshape(1, d_out))


def _proj_add_ln_kernel(x_ref, w_ref, b_ref, r_ref, g_ref, bb_ref, o_ref, *, eps):
    """(x @ Wo + bo) + residual, then LayerNorm — fused epilogue."""
    x = x_ref[...].astype(jnp.bfloat16)
    h = jnp.dot(x, w_ref[...], preferred_element_type=jnp.float32) + b_ref[...]
    h = h + r_ref[...]
    mu = jnp.mean(h, axis=-1, keepdims=True)
    var = jnp.mean(jnp.square(h - mu), axis=-1, keepdims=True)
    o_ref[...] = (h - mu) * jax.lax.rsqrt(var + eps) * g_ref[...] + bb_ref[...]


def proj_add_layernorm(x2d, w_bf16, b, res2d, gamma, beta, eps=LN_EPS):
    M, d_in = x2d.shape
    d_out = w_bf16.shape[1]
    bm = _row_tile(M)
    return pl.pallas_call(
        functools.partial(_proj_add_ln_kernel, eps=eps),
        out_shape=jax.ShapeDtypeStruct((M, d_out), jnp.float32),
        grid=(M // bm,),
        in_specs=[
            pl.BlockSpec((bm, d_in), lambda i: (i, 0)),
            pl.BlockSpec((d_in, d_out), lambda i: (0, 0)),
            pl.BlockSpec((1, d_out), lambda i: (0, 0)),
            pl.BlockSpec((bm, d_out), lambda i: (i, 0)),
            pl.BlockSpec((1, d_out), lambda i: (0, 0)),
            pl.BlockSpec((1, d_out), lambda i: (0, 0)),
        ],
        out_specs=pl.BlockSpec((bm, d_out), lambda i: (i, 0)),
        compiler_params=pltpu.CompilerParams(
            dimension_semantics=("parallel",)),
    )(x2d, w_bf16, b.reshape(1, d_out), res2d,
      gamma.reshape(1, d_out), beta.reshape(1, d_out))


def _ffn_add_ln_kernel(x_ref, w1_ref, b1_ref, w2_ref, b2_ref, g_ref, bb_ref,
                       o_ref, *, eps):
    """relu(x@W1+b1)@W2+b2 + residual(x), then LayerNorm — fused."""
    x = x_ref[...]
    h = jnp.dot(x.astype(jnp.bfloat16), w1_ref[...],
                preferred_element_type=jnp.float32) + b1_ref[...]
    h = jnp.maximum(h, 0.0)
    y = jnp.dot(h.astype(jnp.bfloat16), w2_ref[...],
                preferred_element_type=jnp.float32) + b2_ref[...]
    y = y + x
    mu = jnp.mean(y, axis=-1, keepdims=True)
    var = jnp.mean(jnp.square(y - mu), axis=-1, keepdims=True)
    o_ref[...] = (y - mu) * jax.lax.rsqrt(var + eps) * g_ref[...] + bb_ref[...]


def ffn_add_layernorm(x2d, w1_bf16, b1, w2_bf16, b2, gamma, beta, eps=LN_EPS):
    M, d_model = x2d.shape
    d_ffn = w1_bf16.shape[1]
    bm = _row_tile(M)
    return pl.pallas_call(
        functools.partial(_ffn_add_ln_kernel, eps=eps),
        out_shape=jax.ShapeDtypeStruct((M, d_model), jnp.float32),
        grid=(M // bm,),
        in_specs=[
            pl.BlockSpec((bm, d_model), lambda i: (i, 0)),
            pl.BlockSpec((d_model, d_ffn), lambda i: (0, 0)),
            pl.BlockSpec((1, d_ffn), lambda i: (0, 0)),
            pl.BlockSpec((d_ffn, d_model), lambda i: (0, 0)),
            pl.BlockSpec((1, d_model), lambda i: (0, 0)),
            pl.BlockSpec((1, d_model), lambda i: (0, 0)),
            pl.BlockSpec((1, d_model), lambda i: (0, 0)),
        ],
        out_specs=pl.BlockSpec((bm, d_model), lambda i: (i, 0)),
        compiler_params=pltpu.CompilerParams(
            dimension_semantics=("parallel",)),
    )(x2d, w1_bf16, b1.reshape(1, d_ffn), w2_bf16, b2.reshape(1, d_model),
      gamma.reshape(1, d_model), beta.reshape(1, d_model))


def _mha_core_kernel(q_ref, k_ref, v_ref, m_ref, o_ref, *, num_heads, scale,
                     causal):
    """Scaled-dot-product attention for one batch, all heads looped in-kernel.

    q: (Sq, D), k/v: (Sk, D) with D = num_heads*Dh.  Output written as a
    lane-dense (Sq, D) tile.  Masks are built in-kernel: `m_ref` is a tiny
    additive key-padding row (1, Sk); the causal mask comes from iota.
    """
    q = q_ref[0]
    k = k_ref[0]
    v = v_ref[0]
    sq, d = q.shape
    sk = k.shape[0]
    dh = d // num_heads

    bias = jnp.broadcast_to(m_ref[0], (sq, sk))          # key-padding bias
    if causal:
        row = jax.lax.broadcasted_iota(jnp.int32, (sq, sk), 0)
        col = jax.lax.broadcasted_iota(jnp.int32, (sq, sk), 1)
        bias = bias + jnp.where(row >= col, jnp.float32(0.0),
                                jnp.float32(NEG_INF))

    qb = q.astype(jnp.bfloat16)
    kb = k.astype(jnp.bfloat16)
    vb = v.astype(jnp.bfloat16)

    outs = []
    for h in range(num_heads):
        sl = slice(h * dh, (h + 1) * dh)
        s = jax.lax.dot_general(
            qb[:, sl], kb[:, sl], (((1,), (1,)), ((), ())),
            preferred_element_type=jnp.float32) * scale + bias
        s = s - jnp.max(s, axis=-1, keepdims=True)
        p = jnp.exp(s)
        p = p * pl.reciprocal(jnp.sum(p, axis=-1, keepdims=True), approx=True)
        outs.append(jax.lax.dot_general(
            p.astype(jnp.bfloat16), vb[:, sl], (((1,), (0,)), ((), ())),
            preferred_element_type=jnp.float32))
    o_ref[0] = jnp.concatenate(outs, axis=-1)


def attention_core(q, k, v, key_bias, num_heads, causal):
    """q [B,Sq,D], k/v [B,Sk,D], key_bias [B,1,Sk] additive f32 -> [B,Sq,D]."""
    B, Sq, D = q.shape
    Sk = k.shape[1]
    scale = 1.0 / math.sqrt(D // num_heads)
    return pl.pallas_call(
        functools.partial(_mha_core_kernel, num_heads=num_heads, scale=scale,
                          causal=causal),
        out_shape=jax.ShapeDtypeStruct((B, Sq, D), jnp.float32),
        grid=(B,),
        in_specs=[
            pl.BlockSpec((1, Sq, D), lambda b: (b, 0, 0)),
            pl.BlockSpec((1, Sk, D), lambda b: (b, 0, 0)),
            pl.BlockSpec((1, Sk, D), lambda b: (b, 0, 0)),
            pl.BlockSpec((1, 1, Sk), lambda b: (b, 0, 0)),
        ],
        out_specs=pl.BlockSpec((1, Sq, D), lambda b: (b, 0, 0)),
        compiler_params=pltpu.CompilerParams(
            dimension_semantics=("parallel",)),
    )(q, k, v, key_bias)


# --------------------------- model blocks (JAX glue) -----------------------

def self_attention_block(x, key_bias, p, ln_g, ln_b, num_heads, causal):
    B, S, D = x.shape
    qkv = linear(x.reshape(B * S, D), p["wqkv"], p["bqkv"]).reshape(B, S, 3 * D)
    q, k, v = qkv[..., :D], qkv[..., D:2 * D], qkv[..., 2 * D:]
    ctx = attention_core(q, k, v, key_bias, num_heads, causal)
    return proj_add_layernorm(ctx.reshape(B * S, D), p["wo"], p["bo"],
                              x.reshape(B * S, D), ln_g, ln_b).reshape(B, S, D)


def cross_attention_block(x, enc, key_bias, p, ln_g, ln_b, num_heads):
    B, Sq, D = x.shape
    Sk = enc.shape[1]
    q = linear(x.reshape(B * Sq, D), p["wq"], p["bq"]).reshape(B, Sq, D)
    kv = linear(enc.reshape(B * Sk, D), p["wkv"], p["bkv"]).reshape(B, Sk, 2 * D)
    k, v = kv[..., :D], kv[..., D:]
    ctx = attention_core(q, k, v, key_bias, num_heads, causal=False)
    return proj_add_layernorm(ctx.reshape(B * Sq, D), p["wo"], p["bo"],
                              x.reshape(B * Sq, D), ln_g, ln_b).reshape(B, Sq, D)


def ffn_block(x, p, ln_g, ln_b):
    B, S, D = x.shape
    return ffn_add_layernorm(x.reshape(B * S, D), p["w1"], p["b1"],
                             p["w2"], p["b2"], ln_g, ln_b).reshape(B, S, D)


def encoder_layer(x, src_key_bias, p, num_heads):
    x = self_attention_block(x, src_key_bias, p["self_attn"],
                             p["ln1_g"], p["ln1_b"], num_heads, causal=False)
    x = ffn_block(x, p, p["ln2_g"], p["ln2_b"])
    return x


def decoder_layer(x, enc, tgt_key_bias, src_key_bias, p, num_heads):
    # masked self-attention (causal AND tgt key padding) + residual + LN
    x = self_attention_block(x, tgt_key_bias, p["self_attn"],
                             p["ln1_g"], p["ln1_b"], num_heads, causal=True)
    # cross-attention over encoder output (src key padding) + residual + LN
    x = cross_attention_block(x, enc, src_key_bias, p["cross_attn"],
                              p["ln2_g"], p["ln2_b"], num_heads)
    # position-wise FFN + residual + LN
    x = ffn_block(x, p, p["ln3_g"], p["ln3_b"])
    return x


def transformer_forward(params, src_padding_mask, tgt_padding_mask, src, tgt,
                        num_heads):
    """Mirrors Transformer.forward(src_padding_mask, tgt_padding_mask, src, tgt)."""
    d_model = params["src_embed"].shape[1]
    B, S_src = src.shape
    S_tgt = tgt.shape[1]

    # Token + sinusoidal position embedding (gather + add stay in XLA; tiny).
    # TODO(synk): TokenEmbedding / PositionEmbedding sources not given;
    # standard embedding * sqrt(d_model) + sinusoidal PE is assumed.
    src_emb = params["src_embed"][src] * math.sqrt(d_model)
    tgt_emb = params["tgt_embed"][tgt] * math.sqrt(d_model)
    src_emb = src_emb + params["pos_embed"][:S_src][None, :, :]
    tgt_emb = tgt_emb + params["pos_embed"][:S_tgt][None, :, :]

    # Key-padding additive biases, kept tiny ([B,1,Sk]); expanded in-kernel.
    src_valid = src_padding_mask.reshape(B, 1, S_src)
    tgt_valid = tgt_padding_mask.reshape(B, 1, S_tgt)
    src_key_bias = jnp.where(src_valid, 0.0, NEG_INF).astype(jnp.float32)
    tgt_key_bias = jnp.where(tgt_valid, 0.0, NEG_INF).astype(jnp.float32)

    x = src_emb
    for p in params["encoder_layers"]:
        x = encoder_layer(x, src_key_bias, p, num_heads)
    enc = x

    y = tgt_emb
    for p in params["decoder_layers"]:
        y = decoder_layer(y, enc, tgt_key_bias, src_key_bias, p, num_heads)

    logits = linear(y.reshape(B * S_tgt, d_model),
                    params["w_out"], params["b_out"])
    return logits.reshape(B, S_tgt, -1)


# --------------------------- parameter init --------------------------------

def _init_linear(key, d_in, d_out):
    w = jax.random.normal(key, (d_in, d_out), jnp.float32) / math.sqrt(d_in)
    return w.astype(jnp.bfloat16), jnp.zeros((d_out,), jnp.float32)


def _init_self_attn(key, d):
    kqkv, ko = jax.random.split(key)
    wqkv, bqkv = _init_linear(kqkv, d, 3 * d)
    wo, bo = _init_linear(ko, d, d)
    return {"wqkv": wqkv, "bqkv": bqkv, "wo": wo, "bo": bo}


def _init_cross_attn(key, d):
    kq, kkv, ko = jax.random.split(key, 3)
    wq, bq = _init_linear(kq, d, d)
    wkv, bkv = _init_linear(kkv, d, 2 * d)
    wo, bo = _init_linear(ko, d, d)
    return {"wq": wq, "bq": bq, "wkv": wkv, "bkv": bkv, "wo": wo, "bo": bo}


def _init_ffn(key, d_model, d_ffn):
    k1, k2 = jax.random.split(key)
    w1, b1 = _init_linear(k1, d_model, d_ffn)
    w2, b2 = _init_linear(k2, d_ffn, d_model)
    return {"w1": w1, "b1": b1, "w2": w2, "b2": b2}


def _ln(d):
    return jnp.ones((d,), jnp.float32), jnp.zeros((d,), jnp.float32)


def _sinusoidal_pe(max_len, d_model):
    pos = jnp.arange(max_len, dtype=jnp.float32)[:, None]
    i = jnp.arange(0, d_model, 2, dtype=jnp.float32)[None, :]
    angle = pos / jnp.power(10000.0, i / d_model)
    pe = jnp.zeros((max_len, d_model), jnp.float32)
    pe = pe.at[:, 0::2].set(jnp.sin(angle))
    pe = pe.at[:, 1::2].set(jnp.cos(angle))
    return pe


def init_transformer_params(key, num_enc_layers, num_dec_layers, d_model,
                            d_ffn, src_vocab, tgt_vocab, max_num_words):
    k_src, k_tgt, k_enc, k_dec, k_out = jax.random.split(key, 5)
    params = {
        "src_embed": jax.random.normal(k_src, (src_vocab, d_model), jnp.float32)
                     / math.sqrt(d_model),
        "tgt_embed": jax.random.normal(k_tgt, (tgt_vocab, d_model), jnp.float32)
                     / math.sqrt(d_model),
        "pos_embed": _sinusoidal_pe(max_num_words, d_model),
        "encoder_layers": [],
        "decoder_layers": [],
    }
    for l in range(num_enc_layers):
        lk = jax.random.fold_in(k_enc, l)
        k_sa, k_ff = jax.random.split(lk)
        g1, b1 = _ln(d_model)
        g2, b2 = _ln(d_model)
        layer = {"self_attn": _init_self_attn(k_sa, d_model),
                 "ln1_g": g1, "ln1_b": b1, "ln2_g": g2, "ln2_b": b2}
        layer.update(_init_ffn(k_ff, d_model, d_ffn))
        params["encoder_layers"].append(layer)
    for l in range(num_dec_layers):
        lk = jax.random.fold_in(k_dec, l)
        k_sa, k_ca, k_ff = jax.random.split(lk, 3)
        g1, b1 = _ln(d_model)
        g2, b2 = _ln(d_model)
        g3, b3 = _ln(d_model)
        layer = {"self_attn": _init_self_attn(k_sa, d_model),
                 "cross_attn": _init_cross_attn(k_ca, d_model),
                 "ln1_g": g1, "ln1_b": b1, "ln2_g": g2, "ln2_b": b2,
                 "ln3_g": g3, "ln3_b": b3}
        layer.update(_init_ffn(k_ff, d_model, d_ffn))
        params["decoder_layers"].append(layer)
    w_out, b_out = _init_linear(k_out, d_model, tgt_vocab)
    params["w_out"] = w_out
    params["b_out"] = b_out
    return params


# --------------------------- demo ------------------------------------------

if __name__ == "__main__":
    num_encoder_layers, num_decoder_layers = 2, 2
    num_heads, d_model, d_ffn = 4, 128, 256
    src_vocab_size, tgt_vocab_size = 128, 128
    B, S_src, S_tgt = 2, 8, 8

    root = jax.random.PRNGKey(0)
    k_params, k_src_tok, k_tgt_tok = jax.random.split(root, 3)

    params = init_transformer_params(
        k_params, num_encoder_layers, num_decoder_layers, d_model, d_ffn,
        src_vocab_size, tgt_vocab_size, max_num_words=max(S_src, S_tgt))

    src = jax.random.randint(k_src_tok, (B, S_src), 0, src_vocab_size, jnp.int32)
    tgt = jax.random.randint(k_tgt_tok, (B, S_tgt), 0, tgt_vocab_size, jnp.int32)

    # padding masks [B, 1, S], True = real token (may be attended to);
    # batch 1 has its last 2 source positions padded out.
    src_padding_mask = jnp.array(
        [[True] * S_src,
         [True] * (S_src - 2) + [False] * 2], dtype=bool).reshape(B, 1, S_src)
    tgt_padding_mask = jnp.ones((B, 1, S_tgt), dtype=bool)

    fwd = jax.jit(functools.partial(transformer_forward, num_heads=num_heads))
    out = fwd(params, src_padding_mask, tgt_padding_mask, src, tgt)
    out = jax.block_until_ready(out)

    assert out.shape == (B, S_tgt, tgt_vocab_size)
    assert bool(jnp.all(jnp.isfinite(out)))
    print("KERNEL_OK")
</pallas_src>

<mosaic_0001>
module attributes {stable_mosaic.version = 11 : i64} {
  func.func @_linear_kernel(%arg0: i32, %arg1: memref<16x128xf32, #tpu.memory_space<vmem>>, %arg2: memref<128x384xbf16, #tpu.memory_space<vmem>>, %arg3: memref<1x384xf32, #tpu.memory_space<vmem>>, %arg4: memref<16x384xf32, #tpu.memory_space<vmem>>) attributes {dimension_semantics = [#tpu.dimension_semantics<parallel>], iteration_bounds = array<i64: 1>, scalar_prefetch = 0 : i64, scratch_operands = 0 : i64, tpu.core_type = #tpu.core_type<tc>, window_params = [{transform_indices = @transform_0, window_bounds = array<i64: 16, 128>}, {pipeline_mode = #tpu.pipeline_mode<synchronous>, transform_indices = @transform_1, window_bounds = array<i64: 128, 384>}, {pipeline_mode = #tpu.pipeline_mode<synchronous>, transform_indices = @transform_2, window_bounds = array<i64: 1, 384>}, {transform_indices = @transform_3, window_bounds = array<i64: 16, 384>}]} {
    %c0 = arith.constant 0 : index
    %c0_0 = arith.constant 0 : index
    %0 = vector.load %arg1[%c0, %c0_0] : memref<16x128xf32, #tpu.memory_space<vmem>>, vector<16x128xf32>
    %1 = arith.truncf %0 : vector<16x128xf32> to vector<16x128xbf16>
    %c0_1 = arith.constant 0 : index
    %c0_2 = arith.constant 0 : index
    %2 = vector.load %arg2[%c0_1, %c0_2] : memref<128x384xbf16, #tpu.memory_space<vmem>>, vector<128x384xbf16>
    %cst = arith.constant dense<0.000000e+00> : vector<16x384xf32>
    %3 = tpu.matmul %1, %2, %cst {dimension_numbers = #tpu.dot_dimension_numbers<[1], [0], [0], [1], [0, 0, 1, 1], [], []>} : vector<16x128xbf16>, vector<128x384xbf16>, vector<16x384xf32> -> vector<16x384xf32>
    %c0_3 = arith.constant 0 : index
    %c0_4 = arith.constant 0 : index
    %4 = vector.load %arg3[%c0_3, %c0_4] : memref<1x384xf32, #tpu.memory_space<vmem>>, vector<1x384xf32>
    %5 = vector.broadcast %4 : vector<1x384xf32> to vector<16x384xf32>
    %6 = arith.addf %3, %5 : vector<16x384xf32>
    %c0_5 = arith.constant 0 : index
    %c0_6 = arith.constant 0 : index
    %7 = vector.load %arg4[%c0_5, %c0_6] : memref<16x384xf32, #tpu.memory_space<vmem>>, vector<16x384xf32>
    tpu.vector_store %arg4[%c0_5, %c0_6], %6 {strides = array<i32>} : memref<16x384xf32, #tpu.memory_space<vmem>>, vector<16x384xf32>,
    return
  }
  func.func @transform_0(%arg0: i32) -> (i32, i32) {
    %c0_i32 = arith.constant 0 : i32
    %c0_i32_0 = arith.constant 0 : i32
    return %arg0, %c0_i32 : i32, i32
  }
  func.func @transform_1(%arg0: i32) -> (i32, i32) {
    %c0_i32 = arith.constant 0 : i32
    %c0_i32_0 = arith.constant 0 : i32
    %c0_i32_1 = arith.constant 0 : i32
    return %c0_i32, %c0_i32_0 : i32, i32
  }
  func.func @transform_2(%arg0: i32) -> (i32, i32) {
    %c0_i32 = arith.constant 0 : i32
    %c0_i32_0 = arith.constant 0 : i32
    %c0_i32_1 = arith.constant 0 : i32
    return %c0_i32, %c0_i32_0 : i32, i32
  }
  func.func @transform_3(%arg0: i32) -> (i32, i32) {
    %c0_i32 = arith.constant 0 : i32
    %c0_i32_0 = arith.constant 0 : i32
    return %arg0, %c0_i32 : i32, i32
  }
}

module attributes {stable_mosaic.version = 11 : i64} {
  func.func @_mha_core_kernel(%arg0: i32, %arg1: memref<1x8x128xf32, #tpu.memory_space<vmem>>, %arg2: memref<1x8x128xf32, #tpu.memory_space<vmem>>, %arg3: memref<1x8x128xf32, #tpu.memory_space<vmem>>, %arg4: memref<1x1x8xf32, #tpu.memory_space<vmem>>, %arg5: memref<1x8x128xf32, #tpu.memory_space<vmem>>) attributes {dimension_semantics = [#tpu.dimension_semantics<parallel>], iteration_bounds = array<i64: 2>, scalar_prefetch = 0 : i64, scratch_operands = 0 : i64, tpu.core_type = #tpu.core_type<tc>, window_params = [{transform_indices = @transform_0, window_bounds = array<i64: 1, 8, 128>}, {transform_indices = @transform_1, window_bounds = array<i64: 1, 8, 128>}, {transform_indices = @transform_2, window_bounds = array<i64: 1, 8, 128>}, {transform_indices = @transform_3, window_bounds = array<i64: 1, 1, 8>}, {transform_indices = @transform_4, window_bounds = array<i64: 1, 8, 128>}]} {
    %c0 = arith.constant 0 : index
    %c0_0 = arith.constant 0 : index
    %c0_1 = arith.constant 0 : index
    %0 = vector.load %arg1[%c0, %c0_0, %c0_1] : memref<1x8x128xf32, #tpu.memory_space<vmem>>, vector<1x8x128xf32>
    %1 = vector.shape_cast %0 : vector<1x8x128xf32> to vector<8x128xf32>
    %c0_2 = arith.constant 0 : index
    %c0_3 = arith.constant 0 : index
    %c0_4 = arith.constant 0 : index
    %2 = vector.load %arg2[%c0_2, %c0_3, %c0_4] : memref<1x8x128xf32, #tpu.memory_space<vmem>>, vector<1x8x128xf32>
    %3 = vector.shape_cast %2 : vector<1x8x128xf32> to vector<8x128xf32>
    %c0_5 = arith.constant 0 : index
    %c0_6 = arith.constant 0 : index
    %c0_7 = arith.constant 0 : index
    %4 = vector.load %arg3[%c0_5, %c0_6, %c0_7] : memref<1x8x128xf32, #tpu.memory_space<vmem>>, vector<1x8x128xf32>
    %5 = vector.shape_cast %4 : vector<1x8x128xf32> to vector<8x128xf32>
    %c0_8 = arith.constant 0 : index
    %c0_9 = arith.constant 0 : index
    %c0_10 = arith.constant 0 : index
    %6 = vector.load %arg4[%c0_8, %c0_9, %c0_10] : memref<1x1x8xf32, #tpu.memory_space<vmem>>, vector<1x1x8xf32>
    %7 = vector.shape_cast %6 : vector<1x1x8xf32> to vector<1x8xf32>
    %8 = vector.shape_cast %7 : vector<1x8xf32> to vector<1x8xf32>
    %9 = vector.broadcast %8 : vector<1x8xf32> to vector<8x8xf32>
    %10 = tpu.iota {dimensions = array<i32: 0>} : vector<8x8xi32>
    %11 = tpu.iota {dimensions = array<i32: 1>} : vector<8x8xi32>
    %12 = arith.cmpi sge, %10, %11 : vector<8x8xi32>
    %cst = arith.constant 0.000000e+00 : f32
    %cst_11 = arith.constant -1.000000e+09 : f32
    %13 = vector.broadcast %cst : f32 to vector<8x8xf32>
    %14 = vector.broadcast %cst_11 : f32 to vector<8x8xf32>
    %15 = arith.select %12, %13, %14 : vector<8x8xi1>, vector<8x8xf32>
    %16 = arith.addf %9, %15 : vector<8x8xf32>
    %17 = arith.truncf %1 : vector<8x128xf32> to vector<8x128xbf16>
    %18 = arith.truncf %3 : vector<8x128xf32> to vector<8x128xbf16>
    %19 = arith.truncf %5 : vector<8x128xf32> to vector<8x128xbf16>
    %20 = vector.extract_strided_slice %17 {offsets = [0, 0], sizes = [8, 32], strides = [1, 1]} : vector<8x128xbf16> to vector<8x32xbf16>
    %21 = vector.extract_strided_slice %18 {offsets = [0, 0], sizes = [8, 32], strides = [1, 1]} : vector<8x128xbf16> to vector<8x32xbf16>
    %cst_12 = arith.constant dense<0.000000e+00> : vector<8x8xf32>
    %22 = tpu.matmul %20, %21, %cst_12 {dimension_numbers = #tpu.dot_dimension_numbers<[1], [1], [0], [0], [0, 0, 1, 0], [], []>} : vector<8x32xbf16>, vector<8x32xbf16>, vector<8x8xf32> -> vector<8x8xf32>
    %cst_13 = arith.constant 0.176776692 : f32
    %23 = vector.broadcast %cst_13 : f32 to vector<8x8xf32>
    %24 = arith.mulf %22, %23 : vector<8x8xf32>
    %25 = arith.addf %24, %16 : vector<8x8xf32>
    %cst_14 = arith.constant dense<0xFF800000> : vector<8xf32>
    %26 = vector.multi_reduction <maximumf>, %25, %cst_14 [1] : vector<8x8xf32> to vector<8xf32>
    %27 = vector.shape_cast %26 : vector<8xf32> to vector<8x1xf32>
    %28 = vector.broadcast %27 : vector<8x1xf32> to vector<8x8xf32>
    %29 = arith.subf %25, %28 : vector<8x8xf32>
    %30 = math.exp %29 : vector<8x8xf32>
    %cst_15 = arith.constant dense<0.000000e+00> : vector<8xf32>
    %31 = vector.multi_reduction <add>, %30, %cst_15 [1] : vector<8x8xf32> to vector<8xf32>
    %32 = vector.shape_cast %31 : vector<8xf32> to vector<8x1xf32>
    %33 = tpu.reciprocal %32 {approx = true} : vector<8x1xf32> -> vector<8x1xf32>
    %34 = vector.broadcast %33 : vector<8x1xf32> to vector<8x8xf32>
    %35 = arith.mulf %30, %34 : vector<8x8xf32>
    %36 = arith.truncf %35 : vector<8x8xf32> to vector<8x8xbf16>
    %37 = vector.extract_strided_slice %19 {offsets = [0, 0], sizes = [8, 32], strides = [1, 1]} : vector<8x128xbf16> to vector<8x32xbf16>
    %cst_16 = arith.constant dense<0.000000e+00> : vector<8x32xf32>
    %38 = tpu.matmul %36, %37, %cst_16 {dimension_numbers = #tpu.dot_dimension_numbers<[1], [0], [0], [1], [0, 0, 1, 1], [], []>} : vector<8x8xbf16>, vector<8x32xbf16>, vector<8x32xf32> -> vector<8x32xf32>
    %39 = vector.extract_strided_slice %17 {offsets = [0, 32], sizes = [8, 32], strides = [1, 1]} : vector<8x128xbf16> to vector<8x32xbf16>
    %40 = vector.extract_strided_slice %18 {offsets = [0, 32], sizes = [8, 32], strides = [1, 1]} : vector<8x128xbf16> to vector<8x32xbf16>
    %cst_17 = arith.constant dense<0.000000e+00> : vector<8x8xf32>
    %41 = tpu.matmul %39, %40, %cst_17 {dimension_numbers = #tpu.dot_dimension_numbers<[1], [1], [0], [0], [0, 0, 1, 0], [], []>} : vector<8x32xbf16>, vector<8x32xbf16>, vector<8x8xf32> -> vector<8x8xf32>
    %cst_18 = arith.constant 0.176776692 : f32
    %42 = vector.broadcast %cst_18 : f32 to vector<8x8xf32>
    %43 = arith.mulf %41, %42 : vector<8x8xf32>
    %44 = arith.addf %43, %16 : vector<8x8xf32>
    %cst_19 = arith.constant dense<0xFF800000> : vector<8xf32>
    %45 = vector.multi_reduction <maximumf>, %44, %cst_19 [1] : vector<8x8xf32> to vector<8xf32>
    %46 = vector.shape_cast %45 : vector<8xf32> to vector<8x1xf32>
    %47 = vector.broadcast %46 : vector<8x1xf32> to vector<8x8xf32>
    %48 = arith.subf %44, %47 : vector<8x8xf32>
    %49 = math.exp %48 : vector<8x8xf32>
    %cst_20 = arith.constant dense<0.000000e+00> : vector<8xf32>
    %50 = vector.multi_reduction <add>, %49, %cst_20 [1] : vector<8x8xf32> to vector<8xf32>
    %51 = vector.shape_cast %50 : vector<8xf32> to vector<8x1xf32>
    %52 = tpu.reciprocal %51 {approx = true} : vector<8x1xf32> -> vector<8x1xf32>
    %53 = vector.broadcast %52 : vector<8x1xf32> to vector<8x8xf32>
    %54 = arith.mulf %49, %53 : vector<8x8xf32>
    %55 = arith.truncf %54 : vector<8x8xf32> to vector<8x8xbf16>
    %56 = vector.extract_strided_slice %19 {offsets = [0, 32], sizes = [8, 32], strides = [1, 1]} : vector<8x128xbf16> to vector<8x32xbf16>
    %cst_21 = arith.constant dense<0.000000e+00> : vector<8x32xf32>
    %57 = tpu.matmul %55, %56, %cst_21 {dimension_numbers = #tpu.dot_dimension_numbers<[1], [0], [0], [1], [0, 0, 1, 1], [], []>} : vector<8x8xbf16>, vector<8x32xbf16>, vector<8x32xf32> -> vector<8x32xf32>
    %58 = vector.extract_strided_slice %17 {offsets = [0, 64], sizes = [8, 32], strides = [1, 1]} : vector<8x128xbf16> to vector<8x32xbf16>
    %59 = vector.extract_strided_slice %18 {offsets = [0, 64], sizes = [8, 32], strides = [1, 1]} : vector<8x128xbf16> to vector<8x32xbf16>
    %cst_22 = arith.constant dense<0.000000e+00> : vector<8x8xf32>
    %60 = tpu.matmul %58, %59, %cst_22 {dimension_numbers = #tpu.dot_dimension_numbers<[1], [1], [0], [0], [0, 0, 1, 0], [], []>} : vector<8x32xbf16>, vector<8x32xbf16>, vector<8x8xf32> -> vector<8x8xf32>
    %cst_23 = arith.constant 0.176776692 : f32
    %61 = vector.broadcast %cst_23 : f32 to vector<8x8xf32>
    %62 = arith.mulf %60, %61 : vector<8x8xf32>
    %63 = arith.addf %62, %16 : vector<8x8xf32>
    %cst_24 = arith.constant dense<0xFF800000> : vector<8xf32>
    %64 = vector.multi_reduction <maximumf>, %63, %cst_24 [1] : vector<8x8xf32> to vector<8xf32>
    %65 = vector.shape_cast %64 : vector<8xf32> to vector<8x1xf32>
    %66 = vector.broadcast %65 : vector<8x1xf32> to vector<8x8xf32>
    %67 = arith.subf %63, %66 : vector<8x8xf32>
    %68 = math.exp %67 : vector<8x8xf32>
    %cst_25 = arith.constant dense<0.000000e+00> : vector<8xf32>
    %69 = vector.multi_reduction <add>, %68, %cst_25 [1] : vector<8x8xf32> to vector<8xf32>
    %70 = vector.shape_cast %69 : vector<8xf32> to vector<8x1xf32>
    %71 = tpu.reciprocal %70 {approx = true} : vector<8x1xf32> -> vector<8x1xf32>
    %72 = vector.broadcast %71 : vector<8x1xf32> to vector<8x8xf32>
    %73 = arith.mulf %68, %72 : vector<8x8xf32>
    %74 = arith.truncf %73 : vector<8x8xf32> to vector<8x8xbf16>
    %75 = vector.extract_strided_slice %19 {offsets = [0, 64], sizes = [8, 32], strides = [1, 1]} : vector<8x128xbf16> to vector<8x32xbf16>
    %cst_26 = arith.constant dense<0.000000e+00> : vector<8x32xf32>
    %76 = tpu.matmul %74, %75, %cst_26 {dimension_numbers = #tpu.dot_dimension_numbers<[1], [0], [0], [1], [0, 0, 1, 1], [], []>} : vector<8x8xbf16>, vector<8x32xbf16>, vector<8x32xf32> -> vector<8x32xf32>
    %77 = vector.extract_strided_slice %17 {offsets = [0, 96], sizes = [8, 32], strides = [1, 1]} : vector<8x128xbf16> to vector<8x32xbf16>
    %78 = vector.extract_strided_slice %18 {offsets = [0, 96], sizes = [8, 32], strides = [1, 1]} : vector<8x128xbf16> to vector<8x32xbf16>
    %cst_27 = arith.constant dense<0.000000e+00> : vector<8x8xf32>
    %79 = tpu.matmul %77, %78, %cst_27 {dimension_numbers = #tpu.dot_dimension_numbers<[1], [1], [0], [0], [0, 0, 1, 0], [], []>} : vector<8x32xbf16>, vector<8x32xbf16>, vector<8x8xf32> -> vector<8x8xf32>
    %cst_28 = arith.constant 0.176776692 : f32
    %80 = vector.broadcast %cst_28 : f32 to vector<8x8xf32>
    %81 = arith.mulf %79, %80 : vector<8x8xf32>
    %82 = arith.addf %81, %16 : vector<8x8xf32>
    %cst_29 = arith.constant dense<0xFF800000> : vector<8xf32>
    %83 = vector.multi_reduction <maximumf>, %82, %cst_29 [1] : vector<8x8xf32> to vector<8xf32>
    %84 = vector.shape_cast %83 : vector<8xf32> to vector<8x1xf32>
    %85 = vector.broadcast %84 : vector<8x1xf32> to vector<8x8xf32>
    %86 = arith.subf %82, %85 : vector<8x8xf32>
    %87 = math.exp %86 : vector<8x8xf32>
    %cst_30 = arith.constant dense<0.000000e+00> : vector<8xf32>
    %88 = vector.multi_reduction <add>, %87, %cst_30 [1] : vector<8x8xf32> to vector<8xf32>
    %89 = vector.shape_cast %88 : vector<8xf32> to vector<8x1xf32>
    %90 = tpu.reciprocal %89 {approx = true} : vector<8x1xf32> -> vector<8x1xf32>
    %91 = vector.broadcast %90 : vector<8x1xf32> to vector<8x8xf32>
    %92 = arith.mulf %87, %91 : vector<8x8xf32>
    %93 = arith.truncf %92 : vector<8x8xf32> to vector<8x8xbf16>
    %94 = vector.extract_strided_slice %19 {offsets = [0, 96], sizes = [8, 32], strides = [1, 1]} : vector<8x128xbf16> to vector<8x32xbf16>
    %cst_31 = arith.constant dense<0.000000e+00> : vector<8x32xf32>
    %95 = tpu.matmul %93, %94, %cst_31 {dimension_numbers = #tpu.dot_dimension_numbers<[1], [0], [0], [1], [0, 0, 1, 1], [], []>} : vector<8x8xbf16>, vector<8x32xbf16>, vector<8x32xf32> -> vector<8x32xf32>
    %96 = tpu.concatenate %38, %57, %76, %95 in 1 : vector<8x32xf32>, vector<8x32xf32>, vector<8x32xf32>, vector<8x32xf32> -> vector<8x128xf32>
    %c0_32 = arith.constant 0 : index
    %c0_33 = arith.constant 0 : index
    %c0_34 = arith.constant 0 : index
    %97 = vector.load %arg5[%c0_32, %c0_33, %c0_34] : memref<1x8x128xf32, #tpu.memory_space<vmem>>, vector<1x8x128xf32>
    %98 = vector.shape_cast %97 : vector<1x8x128xf32> to vector<8x128xf32>
    %99 = vector.shape_cast %96 : vector<8x128xf32> to vector<1x8x128xf32>
    tpu.vector_store %arg5[%c0_32, %c0_33, %c0_34], %99 {strides = array<i32>} : memref<1x8x128xf32, #tpu.memory_space<vmem>>, vector<1x8x128xf32>,
    return
  }
  func.func @transform_0(%arg0: i32) -> (i32, i32, i32) {
    %c0_i32 = arith.constant 0 : i32
    %c0_i32_0 = arith.constant 0 : i32
    %c0_i32_1 = arith.constant 0 : i32
    return %arg0, %c0_i32, %c0_i32_0 : i32, i32, i32
  }
  func.func @transform_1(%arg0: i32) -> (i32, i32, i32) {
    %c0_i32 = arith.constant 0 : i32
    %c0_i32_0 = arith.constant 0 : i32
    %c0_i32_1 = arith.constant 0 : i32
    return %arg0, %c0_i32, %c0_i32_0 : i32, i32, i32
  }
  func.func @transform_2(%arg0: i32) -> (i32, i32, i32) {
    %c0_i32 = arith.constant 0 : i32
    %c0_i32_0 = arith.constant 0 : i32
    %c0_i32_1 = arith.constant 0 : i32
    return %arg0, %c0_i32, %c0_i32_0 : i32, i32, i32
  }
  func.func @transform_3(%arg0: i32) -> (i32, i32, i32) {
    %c0_i32 = arith.constant 0 : i32
    %c0_i32_0 = arith.constant 0 : i32
    %c0_i32_1 = arith.constant 0 : i32
    return %arg0, %c0_i32, %c0_i32_0 : i32, i32, i32
  }
  func.func @transform_4(%arg0: i32) -> (i32, i32, i32) {
    %c0_i32 = arith.constant 0 : i32
    %c0_i32_0 = arith.constant 0 : i32
    %c0_i32_1 = arith.constant 0 : i32
    return %arg0, %c0_i32, %c0_i32_0 : i32, i32, i32
  }
}

module attributes {stable_mosaic.version = 11 : i64} {
  func.func @_proj_add_ln_kernel(%arg0: i32, %arg1: memref<16x128xf32, #tpu.memory_space<vmem>>, %arg2: memref<128x128xbf16, #tpu.memory_space<vmem>>, %arg3: memref<1x128xf32, #tpu.memory_space<vmem>>, %arg4: memref<16x128xf32, #tpu.memory_space<vmem>>, %arg5: memref<1x128xf32, #tpu.memory_space<vmem>>, %arg6: memref<1x128xf32, #tpu.memory_space<vmem>>, %arg7: memref<16x128xf32, #tpu.memory_space<vmem>>) attributes {dimension_semantics = [#tpu.dimension_semantics<parallel>], iteration_bounds = array<i64: 1>, scalar_prefetch = 0 : i64, scratch_operands = 0 : i64, tpu.core_type = #tpu.core_type<tc>, window_params = [{transform_indices = @transform_0, window_bounds = array<i64: 16, 128>}, {pipeline_mode = #tpu.pipeline_mode<synchronous>, transform_indices = @transform_1, window_bounds = array<i64: 128, 128>}, {pipeline_mode = #tpu.pipeline_mode<synchronous>, transform_indices = @transform_2, window_bounds = array<i64: 1, 128>}, {transform_indices = @transform_3, window_bounds = array<i64: 16, 128>}, {pipeline_mode = #tpu.pipeline_mode<synchronous>, transform_indices = @transform_4, window_bounds = array<i64: 1, 128>}, {pipeline_mode = #tpu.pipeline_mode<synchronous>, transform_indices = @transform_5, window_bounds = array<i64: 1, 128>}, {transform_indices = @transform_6, window_bounds = array<i64: 16, 128>}]} {
    %c0 = arith.constant 0 : index
    %c0_0 = arith.constant 0 : index
    %0 = vector.load %arg1[%c0, %c0_0] : memref<16x128xf32, #tpu.memory_space<vmem>>, vector<16x128xf32>
    %1 = arith.truncf %0 : vector<16x128xf32> to vector<16x128xbf16>
    %c0_1 = arith.constant 0 : index
    %c0_2 = arith.constant 0 : index
    %2 = vector.load %arg2[%c0_1, %c0_2] : memref<128x128xbf16, #tpu.memory_space<vmem>>, vector<128x128xbf16>
    %cst = arith.constant dense<0.000000e+00> : vector<16x128xf32>
    %3 = tpu.matmul %1, %2, %cst {dimension_numbers = #tpu.dot_dimension_numbers<[1], [0], [0], [1], [0, 0, 1, 1], [], []>} : vector<16x128xbf16>, vector<128x128xbf16>, vector<16x128xf32> -> vector<16x128xf32>
    %c0_3 = arith.constant 0 : index
    %c0_4 = arith.constant 0 : index
    %4 = vector.load %arg3[%c0_3, %c0_4] : memref<1x128xf32, #tpu.memory_space<vmem>>, vector<1x128xf32>
    %5 = vector.broadcast %4 : vector<1x128xf32> to vector<16x128xf32>
    %6 = arith.addf %3, %5 : vector<16x128xf32>
    %c0_5 = arith.constant 0 : index
    %c0_6 = arith.constant 0 : index
    %7 = vector.load %arg4[%c0_5, %c0_6] : memref<16x128xf32, #tpu.memory_space<vmem>>, vector<16x128xf32>
    %8 = arith.addf %6, %7 : vector<16x128xf32>
    %cst_7 = arith.constant dense<0.000000e+00> : vector<16xf32>
    %9 = vector.multi_reduction <add>, %8, %cst_7 [1] : vector<16x128xf32> to vector<16xf32>
    %10 = vector.shape_cast %9 : vector<16xf32> to vector<16x1xf32>
    %cst_8 = arith.constant 1.280000e+02 : f32
    %11 = vector.broadcast %cst_8 : f32 to vector<16x1xf32>
    %12 = arith.divf %10, %11 : vector<16x1xf32>
    %13 = vector.broadcast %12 : vector<16x1xf32> to vector<16x128xf32>
    %14 = arith.subf %8, %13 : vector<16x128xf32>
    %15 = arith.mulf %14, %14 : vector<16x128xf32>
    %cst_9 = arith.constant dense<0.000000e+00> : vector<16xf32>
    %16 = vector.multi_reduction <add>, %15, %cst_9 [1] : vector<16x128xf32> to vector<16xf32>
    %17 = vector.shape_cast %16 : vector<16xf32> to vector<16x1xf32>
    %cst_10 = arith.constant 1.280000e+02 : f32
    %18 = vector.broadcast %cst_10 : f32 to vector<16x1xf32>
    %19 = arith.divf %17, %18 : vector<16x1xf32>
    %20 = vector.broadcast %12 : vector<16x1xf32> to vector<16x128xf32>
    %21 = arith.subf %8, %20 : vector<16x128xf32>
    %cst_11 = arith.constant 9.99999974E-6 : f32
    %22 = vector.broadcast %cst_11 : f32 to vector<16x1xf32>
    %23 = arith.addf %19, %22 : vector<16x1xf32>
    %24 = math.rsqrt %23 : vector<16x1xf32>
    %25 = vector.broadcast %24 : vector<16x1xf32> to vector<16x128xf32>
    %26 = arith.mulf %21, %25 : vector<16x128xf32>
    %c0_12 = arith.constant 0 : index
    %c0_13 = arith.constant 0 : index
    %27 = vector.load %arg5[%c0_12, %c0_13] : memref<1x128xf32, #tpu.memory_space<vmem>>, vector<1x128xf32>
    %28 = vector.broadcast %27 : vector<1x128xf32> to vector<16x128xf32>
    %29 = arith.mulf %26, %28 : vector<16x128xf32>
    %c0_14 = arith.constant 0 : index
    %c0_15 = arith.constant 0 : index
    %30 = vector.load %arg6[%c0_14, %c0_15] : memref<1x128xf32, #tpu.memory_space<vmem>>, vector<1x128xf32>
    %31 = vector.broadcast %30 : vector<1x128xf32> to vector<16x128xf32>
    %32 = arith.addf %29, %31 : vector<16x128xf32>
    %c0_16 = arith.constant 0 : index
    %c0_17 = arith.constant 0 : index
    %33 = vector.load %arg7[%c0_16, %c0_17] : memref<16x128xf32, #tpu.memory_space<vmem>>, vector<16x128xf32>
    tpu.vector_store %arg7[%c0_16, %c0_17], %32 {strides = array<i32>} : memref<16x128xf32, #tpu.memory_space<vmem>>, vector<16x128xf32>,
    return
  }
  func.func @transform_0(%arg0: i32) -> (i32, i32) {
    %c0_i32 = arith.constant 0 : i32
    %c0_i32_0 = arith.constant 0 : i32
    return %arg0, %c0_i32 : i32, i32
  }
  func.func @transform_1(%arg0: i32) -> (i32, i32) {
    %c0_i32 = arith.constant 0 : i32
    %c0_i32_0 = arith.constant 0 : i32
    %c0_i32_1 = arith.constant 0 : i32
    return %c0_i32, %c0_i32_0 : i32, i32
  }
  func.func @transform_2(%arg0: i32) -> (i32, i32) {
    %c0_i32 = arith.constant 0 : i32
    %c0_i32_0 = arith.constant 0 : i32
    %c0_i32_1 = arith.constant 0 : i32
    return %c0_i32, %c0_i32_0 : i32, i32
  }
  func.func @transform_3(%arg0: i32) -> (i32, i32) {
    %c0_i32 = arith.constant 0 : i32
    %c0_i32_0 = arith.constant 0 : i32
    return %arg0, %c0_i32 : i32, i32
  }
  func.func @transform_4(%arg0: i32) -> (i32, i32) {
    %c0_i32 = arith.constant 0 : i32
    %c0_i32_0 = arith.constant 0 : i32
    %c0_i32_1 = arith.constant 0 : i32
    return %c0_i32, %c0_i32_0 : i32, i32
  }
  func.func @transform_5(%arg0: i32) -> (i32, i32) {
    %c0_i32 = arith.constant 0 : i32
    %c0_i32_0 = arith.constant 0 : i32
    %c0_i32_1 = arith.constant 0 : i32
    return %c0_i32, %c0_i32_0 : i32, i32
  }
  func.func @transform_6(%arg0: i32) -> (i32, i32) {
    %c0_i32 = arith.constant 0 : i32
    %c0_i32_0 = arith.constant 0 : i32
    return %arg0, %c0_i32 : i32, i32
  }
}

module attributes {stable_mosaic.version = 11 : i64} {
  func.func @_linear_kernel(%arg0: i32, %arg1: memref<16x128xf32, #tpu.memory_space<vmem>>, %arg2: memref<128x128xbf16, #tpu.memory_space<vmem>>, %arg3: memref<1x128xf32, #tpu.memory_space<vmem>>, %arg4: memref<16x128xf32, #tpu.memory_space<vmem>>) attributes {dimension_semantics = [#tpu.dimension_semantics<parallel>], iteration_bounds = array<i64: 1>, scalar_prefetch = 0 : i64, scratch_operands = 0 : i64, tpu.core_type = #tpu.core_type<tc>, window_params = [{transform_indices = @transform_0, window_bounds = array<i64: 16, 128>}, {pipeline_mode = #tpu.pipeline_mode<synchronous>, transform_indices = @transform_1, window_bounds = array<i64: 128, 128>}, {pipeline_mode = #tpu.pipeline_mode<synchronous>, transform_indices = @transform_2, window_bounds = array<i64: 1, 128>}, {transform_indices = @transform_3, window_bounds = array<i64: 16, 128>}]} {
    %c0 = arith.constant 0 : index
    %c0_0 = arith.constant 0 : index
    %0 = vector.load %arg1[%c0, %c0_0] : memref<16x128xf32, #tpu.memory_space<vmem>>, vector<16x128xf32>
    %1 = arith.truncf %0 : vector<16x128xf32> to vector<16x128xbf16>
    %c0_1 = arith.constant 0 : index
    %c0_2 = arith.constant 0 : index
    %2 = vector.load %arg2[%c0_1, %c0_2] : memref<128x128xbf16, #tpu.memory_space<vmem>>, vector<128x128xbf16>
    %cst = arith.constant dense<0.000000e+00> : vector<16x128xf32>
    %3 = tpu.matmul %1, %2, %cst {dimension_numbers = #tpu.dot_dimension_numbers<[1], [0], [0], [1], [0, 0, 1, 1], [], []>} : vector<16x128xbf16>, vector<128x128xbf16>, vector<16x128xf32> -> vector<16x128xf32>
    %c0_3 = arith.constant 0 : index
    %c0_4 = arith.constant 0 : index
    %4 = vector.load %arg3[%c0_3, %c0_4] : memref<1x128xf32, #tpu.memory_space<vmem>>, vector<1x128xf32>
    %5 = vector.broadcast %4 : vector<1x128xf32> to vector<16x128xf32>
    %6 = arith.addf %3, %5 : vector<16x128xf32>
    %c0_5 = arith.constant 0 : index
    %c0_6 = arith.constant 0 : index
    %7 = vector.load %arg4[%c0_5, %c0_6] : memref<16x128xf32, #tpu.memory_space<vmem>>, vector<16x128xf32>
    tpu.vector_store %arg4[%c0_5, %c0_6], %6 {strides = array<i32>} : memref<16x128xf32, #tpu.memory_space<vmem>>, vector<16x128xf32>,
    return
  }
  func.func @transform_0(%arg0: i32) -> (i32, i32) {
    %c0_i32 = arith.constant 0 : i32
    %c0_i32_0 = arith.constant 0 : i32
    return %arg0, %c0_i32 : i32, i32
  }
  func.func @transform_1(%arg0: i32) -> (i32, i32) {
    %c0_i32 = arith.constant 0 : i32
    %c0_i32_0 = arith.constant 0 : i32
    %c0_i32_1 = arith.constant 0 : i32
    return %c0_i32, %c0_i32_0 : i32, i32
  }
  func.func @transform_2(%arg0: i32) -> (i32, i32) {
    %c0_i32 = arith.constant 0 : i32
    %c0_i32_0 = arith.constant 0 : i32
    %c0_i32_1 = arith.constant 0 : i32
    return %c0_i32, %c0_i32_0 : i32, i32
  }
  func.func @transform_3(%arg0: i32) -> (i32, i32) {
    %c0_i32 = arith.constant 0 : i32
    %c0_i32_0 = arith.constant 0 : i32
    return %arg0, %c0_i32 : i32, i32
  }
}

module attributes {stable_mosaic.version = 11 : i64} {
  func.func @_linear_kernel(%arg0: i32, %arg1: memref<16x128xf32, #tpu.memory_space<vmem>>, %arg2: memref<128x256xbf16, #tpu.memory_space<vmem>>, %arg3: memref<1x256xf32, #tpu.memory_space<vmem>>, %arg4: memref<16x256xf32, #tpu.memory_space<vmem>>) attributes {dimension_semantics = [#tpu.dimension_semantics<parallel>], iteration_bounds = array<i64: 1>, scalar_prefetch = 0 : i64, scratch_operands = 0 : i64, tpu.core_type = #tpu.core_type<tc>, window_params = [{transform_indices = @transform_0, window_bounds = array<i64: 16, 128>}, {pipeline_mode = #tpu.pipeline_mode<synchronous>, transform_indices = @transform_1, window_bounds = array<i64: 128, 256>}, {pipeline_mode = #tpu.pipeline_mode<synchronous>, transform_indices = @transform_2, window_bounds = array<i64: 1, 256>}, {transform_indices = @transform_3, window_bounds = array<i64: 16, 256>}]} {
    %c0 = arith.constant 0 : index
    %c0_0 = arith.constant 0 : index
    %0 = vector.load %arg1[%c0, %c0_0] : memref<16x128xf32, #tpu.memory_space<vmem>>, vector<16x128xf32>
    %1 = arith.truncf %0 : vector<16x128xf32> to vector<16x128xbf16>
    %c0_1 = arith.constant 0 : index
    %c0_2 = arith.constant 0 : index
    %2 = vector.load %arg2[%c0_1, %c0_2] : memref<128x256xbf16, #tpu.memory_space<vmem>>, vector<128x256xbf16>
    %cst = arith.constant dense<0.000000e+00> : vector<16x256xf32>
    %3 = tpu.matmul %1, %2, %cst {dimension_numbers = #tpu.dot_dimension_numbers<[1], [0], [0], [1], [0, 0, 1, 1], [], []>} : vector<16x128xbf16>, vector<128x256xbf16>, vector<16x256xf32> -> vector<16x256xf32>
    %c0_3 = arith.constant 0 : index
    %c0_4 = arith.constant 0 : index
    %4 = vector.load %arg3[%c0_3, %c0_4] : memref<1x256xf32, #tpu.memory_space<vmem>>, vector<1x256xf32>
    %5 = vector.broadcast %4 : vector<1x256xf32> to vector<16x256xf32>
    %6 = arith.addf %3, %5 : vector<16x256xf32>
    %c0_5 = arith.constant 0 : index
    %c0_6 = arith.constant 0 : index
    %7 = vector.load %arg4[%c0_5, %c0_6] : memref<16x256xf32, #tpu.memory_space<vmem>>, vector<16x256xf32>
    tpu.vector_store %arg4[%c0_5, %c0_6], %6 {strides = array<i32>} : memref<16x256xf32, #tpu.memory_space<vmem>>, vector<16x256xf32>,
    return
  }
  func.func @transform_0(%arg0: i32) -> (i32, i32) {
    %c0_i32 = arith.constant 0 : i32
    %c0_i32_0 = arith.constant 0 : i32
    return %arg0, %c0_i32 : i32, i32
  }
  func.func @transform_1(%arg0: i32) -> (i32, i32) {
    %c0_i32 = arith.constant 0 : i32
    %c0_i32_0 = arith.constant 0 : i32
    %c0_i32_1 = arith.constant 0 : i32
    return %c0_i32, %c0_i32_0 : i32, i32
  }
  func.func @transform_2(%arg0: i32) -> (i32, i32) {
    %c0_i32 = arith.constant 0 : i32
    %c0_i32_0 = arith.constant 0 : i32
    %c0_i32_1 = arith.constant 0 : i32
    return %c0_i32, %c0_i32_0 : i32, i32
  }
  func.func @transform_3(%arg0: i32) -> (i32, i32) {
    %c0_i32 = arith.constant 0 : i32
    %c0_i32_0 = arith.constant 0 : i32
    return %arg0, %c0_i32 : i32, i32
  }
}

module attributes {stable_mosaic.version = 11 : i64} {
  func.func @_ffn_add_ln_kernel(%arg0: i32, %arg1: memref<16x128xf32, #tpu.memory_space<vmem>>, %arg2: memref<128x256xbf16, #tpu.memory_space<vmem>>, %arg3: memref<1x256xf32, #tpu.memory_space<vmem>>, %arg4: memref<256x128xbf16, #tpu.memory_space<vmem>>, %arg5: memref<1x128xf32, #tpu.memory_space<vmem>>, %arg6: memref<1x128xf32, #tpu.memory_space<vmem>>, %arg7: memref<1x128xf32, #tpu.memory_space<vmem>>, %arg8: memref<16x128xf32, #tpu.memory_space<vmem>>) attributes {dimension_semantics = [#tpu.dimension_semantics<parallel>], iteration_bounds = array<i64: 1>, scalar_prefetch = 0 : i64, scratch_operands = 0 : i64, tpu.core_type = #tpu.core_type<tc>, window_params = [{transform_indices = @transform_0, window_bounds = array<i64: 16, 128>}, {pipeline_mode = #tpu.pipeline_mode<synchronous>, transform_indices = @transform_1, window_bounds = array<i64: 128, 256>}, {pipeline_mode = #tpu.pipeline_mode<synchronous>, transform_indices = @transform_2, window_bounds = array<i64: 1, 256>}, {pipeline_mode = #tpu.pipeline_mode<synchronous>, transform_indices = @transform_3, window_bounds = array<i64: 256, 128>}, {pipeline_mode = #tpu.pipeline_mode<synchronous>, transform_indices = @transform_4, window_bounds = array<i64: 1, 128>}, {pipeline_mode = #tpu.pipeline_mode<synchronous>, transform_indices = @transform_5, window_bounds = array<i64: 1, 128>}, {pipeline_mode = #tpu.pipeline_mode<synchronous>, transform_indices = @transform_6, window_bounds = array<i64: 1, 128>}, {transform_indices = @transform_7, window_bounds = array<i64: 16, 128>}]} {
    %c0 = arith.constant 0 : index
    %c0_0 = arith.constant 0 : index
    %0 = vector.load %arg1[%c0, %c0_0] : memref<16x128xf32, #tpu.memory_space<vmem>>, vector<16x128xf32>
    %1 = arith.truncf %0 : vector<16x128xf32> to vector<16x128xbf16>
    %c0_1 = arith.constant 0 : index
    %c0_2 = arith.constant 0 : index
    %2 = vector.load %arg2[%c0_1, %c0_2] : memref<128x256xbf16, #tpu.memory_space<vmem>>, vector<128x256xbf16>
    %cst = arith.constant dense<0.000000e+00> : vector<16x256xf32>
    %3 = tpu.matmul %1, %2, %cst {dimension_numbers = #tpu.dot_dimension_numbers<[1], [0], [0], [1], [0, 0, 1, 1], [], []>} : vector<16x128xbf16>, vector<128x256xbf16>, vector<16x256xf32> -> vector<16x256xf32>
    %c0_3 = arith.constant 0 : index
    %c0_4 = arith.constant 0 : index
    %4 = vector.load %arg3[%c0_3, %c0_4] : memref<1x256xf32, #tpu.memory_space<vmem>>, vector<1x256xf32>
    %5 = vector.broadcast %4 : vector<1x256xf32> to vector<16x256xf32>
    %6 = arith.addf %3, %5 : vector<16x256xf32>
    %cst_5 = arith.constant 0.000000e+00 : f32
    %7 = vector.broadcast %cst_5 : f32 to vector<16x256xf32>
    %8 = arith.maximumf %6, %7 : vector<16x256xf32>
    %9 = arith.truncf %8 : vector<16x256xf32> to vector<16x256xbf16>
    %c0_6 = arith.constant 0 : index
    %c0_7 = arith.constant 0 : index
    %10 = vector.load %arg4[%c0_6, %c0_7] : memref<256x128xbf16, #tpu.memory_space<vmem>>, vector<256x128xbf16>
    %cst_8 = arith.constant dense<0.000000e+00> : vector<16x128xf32>
    %11 = tpu.matmul %9, %10, %cst_8 {dimension_numbers = #tpu.dot_dimension_numbers<[1], [0], [0], [1], [0, 0, 1, 1], [], []>} : vector<16x256xbf16>, vector<256x128xbf16>, vector<16x128xf32> -> vector<16x128xf32>
    %c0_9 = arith.constant 0 : index
    %c0_10 = arith.constant 0 : index
    %12 = vector.load %arg5[%c0_9, %c0_10] : memref<1x128xf32, #tpu.memory_space<vmem>>, vector<1x128xf32>
    %13 = vector.broadcast %12 : vector<1x128xf32> to vector<16x128xf32>
    %14 = arith.addf %11, %13 : vector<16x128xf32>
    %15 = arith.addf %14, %0 : vector<16x128xf32>
    %cst_11 = arith.constant dense<0.000000e+00> : vector<16xf32>
    %16 = vector.multi_reduction <add>, %15, %cst_11 [1] : vector<16x128xf32> to vector<16xf32>
    %17 = vector.shape_cast %16 : vector<16xf32> to vector<16x1xf32>
    %cst_12 = arith.constant 1.280000e+02 : f32
    %18 = vector.broadcast %cst_12 : f32 to vector<16x1xf32>
    %19 = arith.divf %17, %18 : vector<16x1xf32>
    %20 = vector.broadcast %19 : vector<16x1xf32> to vector<16x128xf32>
    %21 = arith.subf %15, %20 : vector<16x128xf32>
    %22 = arith.mulf %21, %21 : vector<16x128xf32>
    %cst_13 = arith.constant dense<0.000000e+00> : vector<16xf32>
    %23 = vector.multi_reduction <add>, %22, %cst_13 [1] : vector<16x128xf32> to vector<16xf32>
    %24 = vector.shape_cast %23 : vector<16xf32> to vector<16x1xf32>
    %cst_14 = arith.constant 1.280000e+02 : f32
    %25 = vector.broadcast %cst_14 : f32 to vector<16x1xf32>
    %26 = arith.divf %24, %25 : vector<16x1xf32>
    %27 = vector.broadcast %19 : vector<16x1xf32> to vector<16x128xf32>
    %28 = arith.subf %15, %27 : vector<16x128xf32>
    %cst_15 = arith.constant 9.99999974E-6 : f32
    %29 = vector.broadcast %cst_15 : f32 to vector<16x1xf32>
    %30 = arith.addf %26, %29 : vector<16x1xf32>
    %31 = math.rsqrt %30 : vector<16x1xf32>
    %32 = vector.broadcast %31 : vector<16x1xf32> to vector<16x128xf32>
    %33 = arith.mulf %28, %32 : vector<16x128xf32>
    %c0_16 = arith.constant 0 : index
    %c0_17 = arith.constant 0 : index
    %34 = vector.load %arg6[%c0_16, %c0_17] : memref<1x128xf32, #tpu.memory_space<vmem>>, vector<1x128xf32>
    %35 = vector.broadcast %34 : vector<1x128xf32> to vector<16x128xf32>
    %36 = arith.mulf %33, %35 : vector<16x128xf32>
    %c0_18 = arith.constant 0 : index
    %c0_19 = arith.constant 0 : index
    %37 = vector.load %arg7[%c0_18, %c0_19] : memref<1x128xf32, #tpu.memory_space<vmem>>, vector<1x128xf32>
    %38 = vector.broadcast %37 : vector<1x128xf32> to vector<16x128xf32>
    %39 = arith.addf %36, %38 : vector<16x128xf32>
    %c0_20 = arith.constant 0 : index
    %c0_21 = arith.constant 0 : index
    %40 = vector.load %arg8[%c0_20, %c0_21] : memref<16x128xf32, #tpu.memory_space<vmem>>, vector<16x128xf32>
    tpu.vector_store %arg8[%c0_20, %c0_21], %39 {strides = array<i32>} : memref<16x128xf32, #tpu.memory_space<vmem>>, vector<16x128xf32>,
    return
  }
  func.func @transform_0(%arg0: i32) -> (i32, i32) {
    %c0_i32 = arith.constant 0 : i32
    %c0_i32_0 = arith.constant 0 : i32
    return %arg0, %c0_i32 : i32, i32
  }
  func.func @transform_1(%arg0: i32) -> (i32, i32) {
    %c0_i32 = arith.constant 0 : i32
    %c0_i32_0 = arith.constant 0 : i32
    %c0_i32_1 = arith.constant 0 : i32
    return %c0_i32, %c0_i32_0 : i32, i32
  }
  func.func @transform_2(%arg0: i32) -> (i32, i32) {
    %c0_i32 = arith.constant 0 : i32
    %c0_i32_0 = arith.constant 0 : i32
    %c0_i32_1 = arith.constant 0 : i32
    return %c0_i32, %c0_i32_0 : i32, i32
  }
  func.func @transform_3(%arg0: i32) -> (i32, i32) {
    %c0_i32 = arith.constant 0 : i32
    %c0_i32_0 = arith.constant 0 : i32
    %c0_i32_1 = arith.constant 0 : i32
    return %c0_i32, %c0_i32_0 : i32, i32
  }
  func.func @transform_4(%arg0: i32) -> (i32, i32) {
    %c0_i32 = arith.constant 0 : i32
    %c0_i32_0 = arith.constant 0 : i32
    %c0_i32_1 = arith.constant 0 : i32
    return %c0_i32, %c0_i32_0 : i32, i32
  }
  func.func @transform_5(%arg0: i32) -> (i32, i32) {
    %c0_i32 = arith.constant 0 : i32
    %c0_i32_0 = arith.constant 0 : i32
    %c0_i32_1 = arith.constant 0 : i32
    return %c0_i32, %c0_i32_0 : i32, i32
  }
  func.func @transform_6(%arg0: i32) -> (i32, i32) {
    %c0_i32 = arith.constant 0 : i32
    %c0_i32_0 = arith.constant 0 : i32
    %c0_i32_1 = arith.constant 0 : i32
    return %c0_i32, %c0_i32_0 : i32, i32
  }
  func.func @transform_7(%arg0: i32) -> (i32, i32) {
    %c0_i32 = arith.constant 0 : i32
    %c0_i32_0 = arith.constant 0 : i32
    return %arg0, %c0_i32 : i32, i32
  }
}

module attributes {stable_mosaic.version = 11 : i64} {
  func.func @_mha_core_kernel(%arg0: i32, %arg1: memref<1x8x128xf32, #tpu.memory_space<vmem>>, %arg2: memref<1x8x128xf32, #tpu.memory_space<vmem>>, %arg3: memref<1x8x128xf32, #tpu.memory_space<vmem>>, %arg4: memref<1x1x8xf32, #tpu.memory_space<vmem>>, %arg5: memref<1x8x128xf32, #tpu.memory_space<vmem>>) attributes {dimension_semantics = [#tpu.dimension_semantics<parallel>], iteration_bounds = array<i64: 2>, scalar_prefetch = 0 : i64, scratch_operands = 0 : i64, tpu.core_type = #tpu.core_type<tc>, window_params = [{transform_indices = @transform_0, window_bounds = array<i64: 1, 8, 128>}, {transform_indices = @transform_1, window_bounds = array<i64: 1, 8, 128>}, {transform_indices = @transform_2, window_bounds = array<i64: 1, 8, 128>}, {transform_indices = @transform_3, window_bounds = array<i64: 1, 1, 8>}, {transform_indices = @transform_4, window_bounds = array<i64: 1, 8, 128>}]} {
    %c0 = arith.constant 0 : index
    %c0_0 = arith.constant 0 : index
    %c0_1 = arith.constant 0 : index
    %0 = vector.load %arg1[%c0, %c0_0, %c0_1] : memref<1x8x128xf32, #tpu.memory_space<vmem>>, vector<1x8x128xf32>
    %1 = vector.shape_cast %0 : vector<1x8x128xf32> to vector<8x128xf32>
    %c0_2 = arith.constant 0 : index
    %c0_3 = arith.constant 0 : index
    %c0_4 = arith.constant 0 : index
    %2 = vector.load %arg2[%c0_2, %c0_3, %c0_4] : memref<1x8x128xf32, #tpu.memory_space<vmem>>, vector<1x8x128xf32>
    %3 = vector.shape_cast %2 : vector<1x8x128xf32> to vector<8x128xf32>
    %c0_5 = arith.constant 0 : index
    %c0_6 = arith.constant 0 : index
    %c0_7 = arith.constant 0 : index
    %4 = vector.load %arg3[%c0_5, %c0_6, %c0_7] : memref<1x8x128xf32, #tpu.memory_space<vmem>>, vector<1x8x128xf32>
    %5 = vector.shape_cast %4 : vector<1x8x128xf32> to vector<8x128xf32>
    %c0_8 = arith.constant 0 : index
    %c0_9 = arith.constant 0 : index
    %c0_10 = arith.constant 0 : index
    %6 = vector.load %arg4[%c0_8, %c0_9, %c0_10] : memref<1x1x8xf32, #tpu.memory_space<vmem>>, vector<1x1x8xf32>
    %7 = vector.shape_cast %6 : vector<1x1x8xf32> to vector<1x8xf32>
    %8 = vector.shape_cast %7 : vector<1x8xf32> to vector<1x8xf32>
    %9 = vector.broadcast %8 : vector<1x8xf32> to vector<8x8xf32>
    %10 = arith.truncf %1 : vector<8x128xf32> to vector<8x128xbf16>
    %11 = arith.truncf %3 : vector<8x128xf32> to vector<8x128xbf16>
    %12 = arith.truncf %5 : vector<8x128xf32> to vector<8x128xbf16>
    %13 = vector.extract_strided_slice %10 {offsets = [0, 0], sizes = [8, 32], strides = [1, 1]} : vector<8x128xbf16> to vector<8x32xbf16>
    %14 = vector.extract_strided_slice %11 {offsets = [0, 0], sizes = [8, 32], strides = [1, 1]} : vector<8x128xbf16> to vector<8x32xbf16>
    %cst = arith.constant dense<0.000000e+00> : vector<8x8xf32>
    %15 = tpu.matmul %13, %14, %cst {dimension_numbers = #tpu.dot_dimension_numbers<[1], [1], [0], [0], [0, 0, 1, 0], [], []>} : vector<8x32xbf16>, vector<8x32xbf16>, vector<8x8xf32> -> vector<8x8xf32>
    %cst_11 = arith.constant 0.176776692 : f32
    %16 = vector.broadcast %cst_11 : f32 to vector<8x8xf32>
    %17 = arith.mulf %15, %16 : vector<8x8xf32>
    %18 = arith.addf %17, %9 : vector<8x8xf32>
    %cst_12 = arith.constant dense<0xFF800000> : vector<8xf32>
    %19 = vector.multi_reduction <maximumf>, %18, %cst_12 [1] : vector<8x8xf32> to vector<8xf32>
    %20 = vector.shape_cast %19 : vector<8xf32> to vector<8x1xf32>
    %21 = vector.broadcast %20 : vector<8x1xf32> to vector<8x8xf32>
    %22 = arith.subf %18, %21 : vector<8x8xf32>
    %23 = math.exp %22 : vector<8x8xf32>
    %cst_13 = arith.constant dense<0.000000e+00> : vector<8xf32>
    %24 = vector.multi_reduction <add>, %23, %cst_13 [1] : vector<8x8xf32> to vector<8xf32>
    %25 = vector.shape_cast %24 : vector<8xf32> to vector<8x1xf32>
    %26 = tpu.reciprocal %25 {approx = true} : vector<8x1xf32> -> vector<8x1xf32>
    %27 = vector.broadcast %26 : vector<8x1xf32> to vector<8x8xf32>
    %28 = arith.mulf %23, %27 : vector<8x8xf32>
    %29 = arith.truncf %28 : vector<8x8xf32> to vector<8x8xbf16>
    %30 = vector.extract_strided_slice %12 {offsets = [0, 0], sizes = [8, 32], strides = [1, 1]} : vector<8x128xbf16> to vector<8x32xbf16>
    %cst_14 = arith.constant dense<0.000000e+00> : vector<8x32xf32>
    %31 = tpu.matmul %29, %30, %cst_14 {dimension_numbers = #tpu.dot_dimension_numbers<[1], [0], [0], [1], [0, 0, 1, 1], [], []>} : vector<8x8xbf16>, vector<8x32xbf16>, vector<8x32xf32> -> vector<8x32xf32>
    %32 = vector.extract_strided_slice %10 {offsets = [0, 32], sizes = [8, 32], strides = [1, 1]} : vector<8x128xbf16> to vector<8x32xbf16>
    %33 = vector.extract_strided_slice %11 {offsets = [0, 32], sizes = [8, 32], strides = [1, 1]} : vector<8x128xbf16> to vector<8x32xbf16>
    %cst_15 = arith.constant dense<0.000000e+00> : vector<8x8xf32>
    %34 = tpu.matmul %32, %33, %cst_15 {dimension_numbers = #tpu.dot_dimension_numbers<[1], [1], [0], [0], [0, 0, 1, 0], [], []>} : vector<8x32xbf16>, vector<8x32xbf16>, vector<8x8xf32> -> vector<8x8xf32>
    %cst_16 = arith.constant 0.176776692 : f32
    %35 = vector.broadcast %cst_16 : f32 to vector<8x8xf32>
    %36 = arith.mulf %34, %35 : vector<8x8xf32>
    %37 = arith.addf %36, %9 : vector<8x8xf32>
    %cst_17 = arith.constant dense<0xFF800000> : vector<8xf32>
    %38 = vector.multi_reduction <maximumf>, %37, %cst_17 [1] : vector<8x8xf32> to vector<8xf32>
    %39 = vector.shape_cast %38 : vector<8xf32> to vector<8x1xf32>
    %40 = vector.broadcast %39 : vector<8x1xf32> to vector<8x8xf32>
    %41 = arith.subf %37, %40 : vector<8x8xf32>
    %42 = math.exp %41 : vector<8x8xf32>
    %cst_18 = arith.constant dense<0.000000e+00> : vector<8xf32>
    %43 = vector.multi_reduction <add>, %42, %cst_18 [1] : vector<8x8xf32> to vector<8xf32>
    %44 = vector.shape_cast %43 : vector<8xf32> to vector<8x1xf32>
    %45 = tpu.reciprocal %44 {approx = true} : vector<8x1xf32> -> vector<8x1xf32>
    %46 = vector.broadcast %45 : vector<8x1xf32> to vector<8x8xf32>
    %47 = arith.mulf %42, %46 : vector<8x8xf32>
    %48 = arith.truncf %47 : vector<8x8xf32> to vector<8x8xbf16>
    %49 = vector.extract_strided_slice %12 {offsets = [0, 32], sizes = [8, 32], strides = [1, 1]} : vector<8x128xbf16> to vector<8x32xbf16>
    %cst_19 = arith.constant dense<0.000000e+00> : vector<8x32xf32>
    %50 = tpu.matmul %48, %49, %cst_19 {dimension_numbers = #tpu.dot_dimension_numbers<[1], [0], [0], [1], [0, 0, 1, 1], [], []>} : vector<8x8xbf16>, vector<8x32xbf16>, vector<8x32xf32> -> vector<8x32xf32>
    %51 = vector.extract_strided_slice %10 {offsets = [0, 64], sizes = [8, 32], strides = [1, 1]} : vector<8x128xbf16> to vector<8x32xbf16>
    %52 = vector.extract_strided_slice %11 {offsets = [0, 64], sizes = [8, 32], strides = [1, 1]} : vector<8x128xbf16> to vector<8x32xbf16>
    %cst_20 = arith.constant dense<0.000000e+00> : vector<8x8xf32>
    %53 = tpu.matmul %51, %52, %cst_20 {dimension_numbers = #tpu.dot_dimension_numbers<[1], [1], [0], [0], [0, 0, 1, 0], [], []>} : vector<8x32xbf16>, vector<8x32xbf16>, vector<8x8xf32> -> vector<8x8xf32>
    %cst_21 = arith.constant 0.176776692 : f32
    %54 = vector.broadcast %cst_21 : f32 to vector<8x8xf32>
    %55 = arith.mulf %53, %54 : vector<8x8xf32>
    %56 = arith.addf %55, %9 : vector<8x8xf32>
    %cst_22 = arith.constant dense<0xFF800000> : vector<8xf32>
    %57 = vector.multi_reduction <maximumf>, %56, %cst_22 [1] : vector<8x8xf32> to vector<8xf32>
    %58 = vector.shape_cast %57 : vector<8xf32> to vector<8x1xf32>
    %59 = vector.broadcast %58 : vector<8x1xf32> to vector<8x8xf32>
    %60 = arith.subf %56, %59 : vector<8x8xf32>
    %61 = math.exp %60 : vector<8x8xf32>
    %cst_23 = arith.constant dense<0.000000e+00> : vector<8xf32>
    %62 = vector.multi_reduction <add>, %61, %cst_23 [1] : vector<8x8xf32> to vector<8xf32>
    %63 = vector.shape_cast %62 : vector<8xf32> to vector<8x1xf32>
    %64 = tpu.reciprocal %63 {approx = true} : vector<8x1xf32> -> vector<8x1xf32>
    %65 = vector.broadcast %64 : vector<8x1xf32> to vector<8x8xf32>
    %66 = arith.mulf %61, %65 : vector<8x8xf32>
    %67 = arith.truncf %66 : vector<8x8xf32> to vector<8x8xbf16>
    %68 = vector.extract_strided_slice %12 {offsets = [0, 64], sizes = [8, 32], strides = [1, 1]} : vector<8x128xbf16> to vector<8x32xbf16>
    %cst_24 = arith.constant dense<0.000000e+00> : vector<8x32xf32>
    %69 = tpu.matmul %67, %68, %cst_24 {dimension_numbers = #tpu.dot_dimension_numbers<[1], [0], [0], [1], [0, 0, 1, 1], [], []>} : vector<8x8xbf16>, vector<8x32xbf16>, vector<8x32xf32> -> vector<8x32xf32>
    %70 = vector.extract_strided_slice %10 {offsets = [0, 96], sizes = [8, 32], strides = [1, 1]} : vector<8x128xbf16> to vector<8x32xbf16>
    %71 = vector.extract_strided_slice %11 {offsets = [0, 96], sizes = [8, 32], strides = [1, 1]} : vector<8x128xbf16> to vector<8x32xbf16>
    %cst_25 = arith.constant dense<0.000000e+00> : vector<8x8xf32>
    %72 = tpu.matmul %70, %71, %cst_25 {dimension_numbers = #tpu.dot_dimension_numbers<[1], [1], [0], [0], [0, 0, 1, 0], [], []>} : vector<8x32xbf16>, vector<8x32xbf16>, vector<8x8xf32> -> vector<8x8xf32>
    %cst_26 = arith.constant 0.176776692 : f32
    %73 = vector.broadcast %cst_26 : f32 to vector<8x8xf32>
    %74 = arith.mulf %72, %73 : vector<8x8xf32>
    %75 = arith.addf %74, %9 : vector<8x8xf32>
    %cst_27 = arith.constant dense<0xFF800000> : vector<8xf32>
    %76 = vector.multi_reduction <maximumf>, %75, %cst_27 [1] : vector<8x8xf32> to vector<8xf32>
    %77 = vector.shape_cast %76 : vector<8xf32> to vector<8x1xf32>
    %78 = vector.broadcast %77 : vector<8x1xf32> to vector<8x8xf32>
    %79 = arith.subf %75, %78 : vector<8x8xf32>
    %80 = math.exp %79 : vector<8x8xf32>
    %cst_28 = arith.constant dense<0.000000e+00> : vector<8xf32>
    %81 = vector.multi_reduction <add>, %80, %cst_28 [1] : vector<8x8xf32> to vector<8xf32>
    %82 = vector.shape_cast %81 : vector<8xf32> to vector<8x1xf32>
    %83 = tpu.reciprocal %82 {approx = true} : vector<8x1xf32> -> vector<8x1xf32>
    %84 = vector.broadcast %83 : vector<8x1xf32> to vector<8x8xf32>
    %85 = arith.mulf %80, %84 : vector<8x8xf32>
    %86 = arith.truncf %85 : vector<8x8xf32> to vector<8x8xbf16>
    %87 = vector.extract_strided_slice %12 {offsets = [0, 96], sizes = [8, 32], strides = [1, 1]} : vector<8x128xbf16> to vector<8x32xbf16>
    %cst_29 = arith.constant dense<0.000000e+00> : vector<8x32xf32>
    %88 = tpu.matmul %86, %87, %cst_29 {dimension_numbers = #tpu.dot_dimension_numbers<[1], [0], [0], [1], [0, 0, 1, 1], [], []>} : vector<8x8xbf16>, vector<8x32xbf16>, vector<8x32xf32> -> vector<8x32xf32>
    %89 = tpu.concatenate %31, %50, %69, %88 in 1 : vector<8x32xf32>, vector<8x32xf32>, vector<8x32xf32>, vector<8x32xf32> -> vector<8x128xf32>
    %c0_30 = arith.constant 0 : index
    %c0_31 = arith.constant 0 : index
    %c0_32 = arith.constant 0 : index
    %90 = vector.load %arg5[%c0_30, %c0_31, %c0_32] : memref<1x8x128xf32, #tpu.memory_space<vmem>>, vector<1x8x128xf32>
    %91 = vector.shape_cast %90 : vector<1x8x128xf32> to vector<8x128xf32>
    %92 = vector.shape_cast %89 : vector<8x128xf32> to vector<1x8x128xf32>
    tpu.vector_store %arg5[%c0_30, %c0_31, %c0_32], %92 {strides = array<i32>} : memref<1x8x128xf32, #tpu.memory_space<vmem>>, vector<1x8x128xf32>,
    return
  }
  func.func @transform_0(%arg0: i32) -> (i32, i32, i32) {
    %c0_i32 = arith.constant 0 : i32
    %c0_i32_0 = arith.constant 0 : i32
    %c0_i32_1 = arith.constant 0 : i32
    return %arg0, %c0_i32, %c0_i32_0 : i32, i32, i32
  }
  func.func @transform_1(%arg0: i32) -> (i32, i32, i32) {
    %c0_i32 = arith.constant 0 : i32
    %c0_i32_0 = arith.constant 0 : i32
    %c0_i32_1 = arith.constant 0 : i32
    return %arg0, %c0_i32, %c0_i32_0 : i32, i32, i32
  }
  func.func @transform_2(%arg0: i32) -> (i32, i32, i32) {
    %c0_i32 = arith.constant 0 : i32
    %c0_i32_0 = arith.constant 0 : i32
    %c0_i32_1 = arith.constant 0 : i32
    return %arg0, %c0_i32, %c0_i32_0 : i32, i32, i32
  }
  func.func @transform_3(%arg0: i32) -> (i32, i32, i32) {
    %c0_i32 = arith.constant 0 : i32
    %c0_i32_0 = arith.constant 0 : i32
    %c0_i32_1 = arith.constant 0 : i32
    return %arg0, %c0_i32, %c0_i32_0 : i32, i32, i32
  }
  func.func @transform_4(%arg0: i32) -> (i32, i32, i32) {
    %c0_i32 = arith.constant 0 : i32
    %c0_i32_0 = arith.constant 0 : i32
    %c0_i32_1 = arith.constant 0 : i32
    return %arg0, %c0_i32, %c0_i32_0 : i32, i32, i32
  }
}

module attributes {stable_mosaic.version = 11 : i64} {
  func.func @_linear_kernel(%arg0: i32, %arg1: memref<16x128xf32, #tpu.memory_space<vmem>>, %arg2: memref<128x128xbf16, #tpu.memory_space<vmem>>, %arg3: memref<1x128xf32, #tpu.memory_space<vmem>>, %arg4: memref<16x128xf32, #tpu.memory_space<vmem>>) attributes {dimension_semantics = [#tpu.dimension_semantics<parallel>], iteration_bounds = array<i64: 1>, scalar_prefetch = 0 : i64, scratch_operands = 0 : i64, tpu.core_type = #tpu.core_type<tc>, window_params = [{transform_indices = @transform_0, window_bounds = array<i64: 16, 128>}, {pipeline_mode = #tpu.pipeline_mode<synchronous>, transform_indices = @transform_1, window_bounds = array<i64: 128, 128>}, {pipeline_mode = #tpu.pipeline_mode<synchronous>, transform_indices = @transform_2, window_bounds = array<i64: 1, 128>}, {transform_indices = @transform_3, window_bounds = array<i64: 16, 128>}]} {
    %c0 = arith.constant 0 : index
    %c0_0 = arith.constant 0 : index
    %0 = vector.load %arg1[%c0, %c0_0] : memref<16x128xf32, #tpu.memory_space<vmem>>, vector<16x128xf32>
    %1 = arith.truncf %0 : vector<16x128xf32> to vector<16x128xbf16>
    %c0_1 = arith.constant 0 : index
    %c0_2 = arith.constant 0 : index
    %2 = vector.load %arg2[%c0_1, %c0_2] : memref<128x128xbf16, #tpu.memory_space<vmem>>, vector<128x128xbf16>
    %cst = arith.constant dense<0.000000e+00> : vector<16x128xf32>
    %3 = tpu.matmul %1, %2, %cst {dimension_numbers = #tpu.dot_dimension_numbers<[1], [0], [0], [1], [0, 0, 1, 1], [], []>} : vector<16x128xbf16>, vector<128x128xbf16>, vector<16x128xf32> -> vector<16x128xf32>
    %c0_3 = arith.constant 0 : index
    %c0_4 = arith.constant 0 : index
    %4 = vector.load %arg3[%c0_3, %c0_4] : memref<1x128xf32, #tpu.memory_space<vmem>>, vector<1x128xf32>
    %5 = vector.broadcast %4 : vector<1x128xf32> to vector<16x128xf32>
    %6 = arith.addf %3, %5 : vector<16x128xf32>
    %c0_5 = arith.constant 0 : index
    %c0_6 = arith.constant 0 : index
    %7 = vector.load %arg4[%c0_5, %c0_6] : memref<16x128xf32, #tpu.memory_space<vmem>>, vector<16x128xf32>
    tpu.vector_store %arg4[%c0_5, %c0_6], %6 {strides = array<i32>} : memref<16x128xf32, #tpu.memory_space<vmem>>, vector<16x128xf32>,
    return
  }
  func.func @transform_0(%arg0: i32) -> (i32, i32) {
    %c0_i32 = arith.constant 0 : i32
    %c0_i32_0 = arith.constant 0 : i32
    return %arg0, %c0_i32 : i32, i32
  }
  func.func @transform_1(%arg0: i32) -> (i32, i32) {
    %c0_i32 = arith.constant 0 : i32
    %c0_i32_0 = arith.constant 0 : i32
    %c0_i32_1 = arith.constant 0 : i32
    return %c0_i32, %c0_i32_0 : i32, i32
  }
  func.func @transform_2(%arg0: i32) -> (i32, i32) {
    %c0_i32 = arith.constant 0 : i32
    %c0_i32_0 = arith.constant 0 : i32
    %c0_i32_1 = arith.constant 0 : i32
    return %c0_i32, %c0_i32_0 : i32, i32
  }
  func.func @transform_3(%arg0: i32) -> (i32, i32) {
    %c0_i32 = arith.constant 0 : i32
    %c0_i32_0 = arith.constant 0 : i32
    return %arg0, %c0_i32 : i32, i32
  }
}

</mosaic_0001>

<bundles_post_ra>
// kernel: transformer_forward.35
= control target key start
LH: loop header
LB: loop body
LE: loop exit
PB: predicated region body
PF: predicated region fallthrough
CT: control target
= control target key end

     0   :  { %v244_v0 = vmov 0.0   ;;  %vm245_vm0 = vmmov 0   ;;  %s332_s1 = inlined_call_operand.vmem [shape: bf16[128,128], index: 1, kind: input, shape index: {}]   ;;  %s333_s0 = inlined_call_operand.vmem [shape: f32[16,128], index: 0, kind: input, shape index: {}]   ;;  %s334_s2 = inlined_call_operand.vmem [shape: f32[1,128], index: 2, kind: input, shape index: {}]   ;;  %s335_s3 = inlined_call_operand.vmem [shape: f32[16,128], index: 3, kind: input, shape index: {}]   ;;  %s336_s4 = inlined_call_operand.vmem [shape: f32[1,128], index: 4, kind: input, shape index: {}]   ;;  %s337_s5 = inlined_call_operand.vmem [shape: f32[1,128], index: 5, kind: input, shape index: {}]   ;;  %s338_s6 = inlined_call_operand.vmem [shape: f32[16,128], index: 6, kind: output, shape index: {}]  }
   0x1   :  { %210 = vmatprep.subr.bf16.mxu0 %v244_v0  ;;  %v232_v1 = vld [vmem:[%s332_s1 + $0x38] sm:$0xff]   ;;  %226 = vmatprep.mubr.msk.bf16.mxu0 %vm245_vm0, %v244_v0  ;;  %v233_v2 = vld [vmem:[%s332_s1 + $0x30] sm:$0xff]   ;;  %v234_v3 = vld [vmem:[%s332_s1 + $0x28] sm:$0xff]  }
   0x2   :  { %211 = vmatpush3.bf16.msra.mxu0 %v232_v1  ;;  %v235_v4 = vld [vmem:[%s332_s1 + $0x20] sm:$0xff]   ;;  %v236_v5 = vld [vmem:[%s332_s1 + $0x18] sm:$0xff]   ;;  %v237_v6 = vld [vmem:[%s332_s1 + $0x10] sm:$0xff]  }
   0x3   :  { %212 = vmatprep.subr.bf16.mxu0 %v244_v0  ;;  %v238_v7 = vld [vmem:[%s332_s1 + $0x8] sm:$0xff]   ;;  %v239_v8 = vld [vmem:[%s332_s1] sm:$0xff]  }
   0x4   :  { %v24_v9 = vld [vmem:[%s333_s0] sm:$0xff]  ;;  %v25_v10 = vld [vmem:[%s333_s0 + $0x8] sm:$0xff] }
   0x5   :  { %v26_v11 = vpack.c.bf16 %v25_v10, %v24_v9  ;;  %v190_v12 = vld [vmem:[%s334_s2] ss:$0 sm:$0xff]  ;;  %v140_v19 = vld [vmem:[%s335_s3 + $0x8] sm:$0xff] }
   0x6   :  { %213 = vmatpush3.bf16.msra.mxu0 %v233_v2  ;;  %v139_v14 = vld [vmem:[%s335_s3] sm:$0xff] }
   0x7   :  { %214 = vmatprep.subr.bf16.mxu0 %v244_v0  ;;  %v199_v38 = vld [vmem:[%s336_s4] ss:$0 sm:$0xff] }
   0x8   :  { %v200_v40 = vld [vmem:[%s337_s5] ss:$0 sm:$0xff] }
   0xa   :  { %215 = vmatpush3.bf16.msra.mxu0 %v234_v3 }
   0xb   :  { %216 = vmatprep.subr.bf16.mxu0 %v244_v0 }
   0xe   :  { %217 = vmatpush3.bf16.msra.mxu0 %v235_v4 }
   0xf   :  { %218 = vmatprep.subr.bf16.mxu0 %v244_v0 }
  0x12   :  { %219 = vmatpush3.bf16.msra.mxu0 %v236_v5 }
  0x13   :  { %220 = vmatprep.subr.bf16.mxu0 %v244_v0 }
  0x16   :  { %221 = vmatpush3.bf16.msra.mxu0 %v237_v6 }
  0x17   :  { %222 = vmatprep.subr.bf16.mxu0 %v244_v0 }
  0x1a   :  { %223 = vmatpush3.bf16.msra.mxu0 %v238_v7 }
  0x1b   :  { %224 = vmatprep.subr.bf16.mxu0 %v244_v0 }
  0x1e   :  { %225 = vmatpush3.bf16.msra.mxu0 %v239_v8 }
  0x21   :  { %227 = vmatmul.mubr.bf16.vlgmr.msra.gmra.mxu0 %v26_v11 }
  0xe1   :  { %v132_v13 = vpop.f32.mrf.mxu0 }
  0xe2   :  { %v133_v15 = vadd.f32 %v190_v12, %v132_v13 }
  0xe3   :  { %v228_v16 = vpop.f32.mrf.mxu0 }
  0xe4   :  { %v141_v17 = vadd.f32 %v139_v14, %v133_v15 }
  0xe5   :  { %v135_v18 = vpop.f32.mrf.mxu0 }
  0xe6   :  { %v136_v20 = vadd.f32 %v190_v12, %v135_v18  ;;  %143 = vadd.xlane.f32.xlu0 %v141_v17 }
  0xe7   :  { %v229_v21 = vpop.f32.mrf.mxu0 }
  0xe8   :  { %v142_v22 = vadd.f32 %v140_v19, %v136_v20 }
  0xea   :  { %145 = vadd.xlane.f32.xlu0 %v142_v22 }
 0x16f   :  { %v144_v23 = vpop.xlane.xlu0 %143 }
 0x170   :  { %v148_v24 = vmul.f32 0.0078125, %v144_v23 }
 0x172   :  { %v150_v25 = vsub.f32 %v141_v17, %v148_v24 }
 0x173   :  { %v146_v26 = vpop.xlane.xlu0 %145 }
 0x174   :  { %v149_v27 = vmul.f32 0.0078125, %v146_v26  ;;  %v152_v28 = vmul.f32 %v150_v25, %v150_v25 }
 0x176   :  { %v151_v29 = vsub.f32 %v142_v22, %v149_v27  ;;  %154 = vadd.xlane.f32.xlu1 %v152_v28 }
 0x178   :  { %v153_v30 = vmul.f32 %v151_v29, %v151_v29 }
 0x17a   :  { %156 = vadd.xlane.f32.xlu1 %v153_v30 }
 0x1ff   :  { %v155_v31 = vpop.xlane.xlu1 %154 }
 0x200   :  { %v158_v32 = vmul.f32 0.0078125, %v155_v31 }
 0x202   :  { %v160_v33 = vadd.f32 1e-05, %v158_v32 }
 0x203   :  { %v157_v34 = vpop.xlane.xlu1 %156 }
 0x204   :  { %240 = vrsqrt.f32 %v160_v33  ;;  %v159_v35 = vmul.f32 0.0078125, %v157_v34 }
 0x206   :  { %v161_v36 = vadd.f32 1e-05, %v159_v35 }
 0x208   :  { %242 = vrsqrt.f32 %v161_v36 }
 0x211   :  { %v241_v37 = vpop.eup %240 }
 0x212   :  { %v164_v39 = vmul.f32 %v241_v37, %v150_v25 }
 0x214   :  { %v173_v41 = vmul.f32 %v199_v38, %v164_v39 }
 0x215   :  { %v243_v42 = vpop.eup %242 }
 0x216   :  { %v182_v43 = vadd.f32 %v200_v40, %v173_v41  ;;  %v165_v44 = vmul.f32 %v243_v42, %v151_v29 }
 0x218   :  { %184 = vst [vmem:[%s338_s6] sm:$0xff] %v182_v43  ;;  %v174_v45 = vmul.f32 %v199_v38, %v165_v44 }
 0x21a   :  { %v183_v46 = vadd.f32 %v200_v40, %v174_v45 }
 0x21c   :  { %185 = vst [vmem:[%s338_s6 + $0x8] sm:$0xff] %v183_v46 }

// kernel: transformer_forward.36
= control target key start
LH: loop header
LB: loop body
LE: loop exit
PB: predicated region body
PF: predicated region fallthrough
CT: control target
= control target key end

     0   :  { %v184_v0 = vmov 0.0   ;;  %vm185_vm0 = vmmov 0   ;;  %s245_s1 = inlined_call_operand.vmem [shape: bf16[128,128], index: 1, kind: input, shape index: {}]   ;;  %s246_s0 = inlined_call_operand.vmem [shape: f32[16,128], index: 0, kind: input, shape index: {}]   ;;  %s247_s2 = inlined_call_operand.vmem [shape: f32[1,128], index: 2, kind: input, shape index: {}]   ;;  %s248_s3 = inlined_call_operand.vmem [shape: f32[16,128], index: 3, kind: output, shape index: {}]  }
   0x1   :  { %154 = vmatprep.subr.bf16.mxu0 %v184_v0  ;;  %v176_v1 = vld [vmem:[%s245_s1 + $0x38] sm:$0xff]   ;;  %170 = vmatprep.mubr.msk.bf16.mxu0 %vm185_vm0, %v184_v0  ;;  %v177_v2 = vld [vmem:[%s245_s1 + $0x30] sm:$0xff]   ;;  %v178_v3 = vld [vmem:[%s245_s1 + $0x28] sm:$0xff]  }
   0x2   :  { %155 = vmatpush3.bf16.msra.mxu0 %v176_v1  ;;  %v179_v4 = vld [vmem:[%s245_s1 + $0x20] sm:$0xff]   ;;  %v180_v5 = vld [vmem:[%s245_s1 + $0x18] sm:$0xff]   ;;  %v181_v6 = vld [vmem:[%s245_s1 + $0x10] sm:$0xff]  }
   0x3   :  { %156 = vmatprep.subr.bf16.mxu0 %v184_v0  ;;  %v182_v7 = vld [vmem:[%s245_s1 + $0x8] sm:$0xff]   ;;  %v183_v8 = vld [vmem:[%s245_s1] sm:$0xff]  }
   0x4   :  { %v15_v9 = vld [vmem:[%s246_s0] sm:$0xff]  ;;  %v16_v10 = vld [vmem:[%s246_s0 + $0x8] sm:$0xff] }
   0x5   :  { %v17_v11 = vpack.c.bf16 %v16_v10, %v15_v9  ;;  %v136_v12 = vld [vmem:[%s247_s2] ss:$0 sm:$0xff] }
   0x6   :  { %157 = vmatpush3.bf16.msra.mxu0 %v177_v2 }
   0x7   :  { %158 = vmatprep.subr.bf16.mxu0 %v184_v0 }
   0xa   :  { %159 = vmatpush3.bf16.msra.mxu0 %v178_v3 }
   0xb   :  { %160 = vmatprep.subr.bf16.mxu0 %v184_v0 }
   0xe   :  { %161 = vmatpush3.bf16.msra.mxu0 %v179_v4 }
   0xf   :  { %162 = vmatprep.subr.bf16.mxu0 %v184_v0 }
  0x12   :  { %163 = vmatpush3.bf16.msra.mxu0 %v180_v5 }
  0x13   :  { %164 = vmatprep.subr.bf16.mxu0 %v184_v0 }
  0x16   :  { %165 = vmatpush3.bf16.msra.mxu0 %v181_v6 }
  0x17   :  { %166 = vmatprep.subr.bf16.mxu0 %v184_v0 }
  0x1a   :  { %167 = vmatpush3.bf16.msra.mxu0 %v182_v7 }
  0x1b   :  { %168 = vmatprep.subr.bf16.mxu0 %v184_v0 }
  0x1e   :  { %169 = vmatpush3.bf16.msra.mxu0 %v183_v8 }
  0x21   :  { %171 = vmatmul.mubr.bf16.vlgmr.msra.gmra.mxu0 %v17_v11 }
  0xe1   :  { %v123_v13 = vpop.f32.mrf.mxu0 }
  0xe2   :  { %v124_v14 = vadd.f32 %v136_v12, %v123_v13 }
  0xe3   :  { %v172_v15 = vpop.f32.mrf.mxu0 }
  0xe4   :  { %130 = vst [vmem:[%s248_s3] sm:$0xff] %v124_v14 }
  0xe5   :  { %v126_v16 = vpop.f32.mrf.mxu0 }
  0xe6   :  { %v127_v17 = vadd.f32 %v136_v12, %v126_v16 }
  0xe7   :  { %v173_v18 = vpop.f32.mrf.mxu0 }
  0xe8   :  { %131 = vst [vmem:[%s248_s3 + $0x8] sm:$0xff] %v127_v17 }

// kernel: transformer_forward.33
= control target key start
LH: loop header
LB: loop body
LE: loop exit
PB: predicated region body
PF: predicated region fallthrough
CT: control target
= control target key end

     0   :  { %v377_v0 = vmov 0.0   ;;  %vm378_vm0 = vmmov 0   ;;  %v379_v3 = vmov 0   ;;  %v52_v29 = vlaneseq  ;;  %s499_s1 = inlined_call_operand.vmem [shape: bf16[128,384], index: 1, kind: input, shape index: {}]   ;;  %s500_s0 = inlined_call_operand.vmem [shape: f32[16,128], index: 0, kind: input, shape index: {}]   ;;  %s501_s2 = inlined_call_operand.vmem [shape: f32[1,384], index: 2, kind: input, shape index: {}]   ;;  %s502_s3 = inlined_call_operand.vmem [shape: f32[16,384], index: 3, kind: output, shape index: {}]  }
   0x1   :  { %322 = vmatprep.subr.bf16.mxu1 %v377_v0  ;;  %v345_v1 = vld [vmem:[%s499_s1 + $0xac] ss:$12 sps:$4 sm:$0xff]   ;;  %338 = vmatprep.mubr.msk.bf16.mxu1 %vm378_vm0, %v377_v0  ;;  %v347_v2 = vld [vmem:[%s499_s1 + $0xb0] ss:$12 sps:$4 sm:$0xff]   ;;  %v348_v4 = vld [vmem:[%s499_s1 + $0xa8] ss:$12 sps:$4 sm:$0xff]  }
   0x2   :  { %227 = vmatprep.mubr.bf16.mxu0 %v379_v3  ;;  %195 = vmatprep.subr.bf16.mxu0 %v345_v1  ;;  %v349_v5 = vld [vmem:[%s499_s1 + $0x94] ss:$12 sps:$4 sm:$0xff]   ;;  %v351_v6 = vld [vmem:[%s499_s1 + $0x98] ss:$12 sps:$4 sm:$0xff]   ;;  %v352_v7 = vld [vmem:[%s499_s1 + $0x90] ss:$12 sps:$4 sm:$0xff]  }
   0x3   :  { %323 = vmatpush3.bf16.msra.mxu1 %v347_v2  ;;  %196 = vmatpush1.bf16.msra.mxu0 %v348_v4  ;;  %v353_v8 = vld [vmem:[%s499_s1 + $0x7c] ss:$12 sps:$4 sm:$0xff]   ;;  %v355_v9 = vld [vmem:[%s499_s1 + $0x80] ss:$12 sps:$4 sm:$0xff]   ;;  %v356_v10 = vld [vmem:[%s499_s1 + $0x78] ss:$12 sps:$4 sm:$0xff]  }
   0x4   :  { %324 = vmatprep.subr.bf16.mxu1 %v377_v0  ;;  %197 = vmatprep.subr.bf16.mxu0 %v349_v5  ;;  %v357_v11 = vld [vmem:[%s499_s1 + $0x64] ss:$12 sps:$4 sm:$0xff]   ;;  %v359_v12 = vld [vmem:[%s499_s1 + $0x68] ss:$12 sps:$4 sm:$0xff]   ;;  %v360_v13 = vld [vmem:[%s499_s1 + $0x60] ss:$12 sps:$4 sm:$0xff]  }
   0x5   :  { %v361_v14 = vld [vmem:[%s499_s1 + $0x4c] ss:$12 sps:$4 sm:$0xff]   ;;  %v363_v15 = vld [vmem:[%s499_s1 + $0x50] ss:$12 sps:$4 sm:$0xff]   ;;  %v364_v16 = vld [vmem:[%s499_s1 + $0x48] ss:$12 sps:$4 sm:$0xff]  }
   0x6   :  { %v365_v17 = vld [vmem:[%s499_s1 + $0x34] ss:$12 sps:$4 sm:$0xff]   ;;  %v367_v18 = vld [vmem:[%s499_s1 + $0x38] ss:$12 sps:$4 sm:$0xff]   ;;  %v368_v19 = vld [vmem:[%s499_s1 + $0x30] ss:$12 sps:$4 sm:$0xff]  }
   0x7   :  { %325 = vmatpush3.bf16.msra.mxu1 %v351_v6  ;;  %198 = vmatpush1.bf16.msra.mxu0 %v352_v7  ;;  %v369_v20 = vld [vmem:[%s499_s1 + $0x1c] ss:$12 sps:$4 sm:$0xff]   ;;  %v371_v21 = vld [vmem:[%s499_s1 + $0x20] ss:$12 sps:$4 sm:$0xff]   ;;  %v372_v22 = vld [vmem:[%s499_s1 + $0x18] ss:$12 sps:$4 sm:$0xff]  }
   0x8   :  { %326 = vmatprep.subr.bf16.mxu1 %v377_v0  ;;  %199 = vmatprep.subr.bf16.mxu0 %v353_v8  ;;  %v373_v23 = vld [vmem:[%s499_s1 + $0x4] ss:$12 sps:$4 sm:$0xff]   ;;  %v375_v24 = vld [vmem:[%s499_s1 + $0x8] ss:$12 sps:$4 sm:$0xff]   ;;  %v376_v27 = vld [vmem:[%s499_s1] ss:$12 sps:$4 sm:$0xff]  }
   0x9   :  { %v15_v25 = vld [vmem:[%s500_s0] sm:$0xff]  ;;  %v16_v26 = vld [vmem:[%s500_s0 + $0x8] sm:$0xff]  ;;  %v53_v30 = vshrl.u32 %v52_v29, 7 }
   0xa   :  { %v17_v28 = vpack.c.bf16 %v16_v26, %v15_v25  ;;  %v50_v33 = vld [vmem:[%s501_s2] sm:$0x7] }
   0xb   :  { %327 = vmatpush3.bf16.msra.mxu1 %v355_v9  ;;  %200 = vmatpush1.bf16.msra.mxu0 %v356_v10  ;;  %v62_v31 = vsub.s32 2, %v53_v30  ;;  %v54_v32 = vsub.s32 0, %v53_v30  ;;  %v58_v34 = vsub.s32 1, %v53_v30 }
   0xc   :  { %328 = vmatprep.subr.bf16.mxu1 %v377_v0  ;;  %201 = vmatprep.subr.bf16.mxu0 %v357_v11 }
   0xd   :  { %v63_v35 = vrot.slane %v50_v33, %v62_v31  ;;  %v55_v36 = vrot.slane %v50_v33, %v54_v32  ;;  %v59_v38 = vrot.slane %v50_v33, %v58_v34 }
   0xf   :  { %329 = vmatpush3.bf16.msra.mxu1 %v359_v12  ;;  %202 = vmatpush1.bf16.msra.mxu0 %v360_v13 }
  0x10   :  { %330 = vmatprep.subr.bf16.mxu1 %v377_v0  ;;  %203 = vmatprep.subr.bf16.mxu0 %v361_v14 }
  0x13   :  { %331 = vmatpush3.bf16.msra.mxu1 %v363_v15  ;;  %204 = vmatpush1.bf16.msra.mxu0 %v364_v16 }
  0x14   :  { %332 = vmatprep.subr.bf16.mxu1 %v377_v0  ;;  %205 = vmatprep.subr.bf16.mxu0 %v365_v17 }
  0x17   :  { %333 = vmatpush3.bf16.msra.mxu1 %v367_v18  ;;  %206 = vmatpush1.bf16.msra.mxu0 %v368_v19 }
  0x18   :  { %334 = vmatprep.subr.bf16.mxu1 %v377_v0  ;;  %207 = vmatprep.subr.bf16.mxu0 %v369_v20 }
  0x1b   :  { %335 = vmatpush3.bf16.msra.mxu1 %v371_v21  ;;  %208 = vmatpush1.bf16.msra.mxu0 %v372_v22 }
  0x1c   :  { %336 = vmatprep.subr.bf16.mxu1 %v377_v0  ;;  %209 = vmatprep.subr.bf16.mxu0 %v373_v23 }
  0x1f   :  { %337 = vmatpush3.bf16.msra.mxu1 %v375_v24  ;;  %210 = vmatpush1.bf16.msra.mxu0 %v376_v27 }
  0x22   :  { %339 = vmatmul.mubr.bf16.vlgmr.msra.gmra.mxu1 %v17_v28  ;;  %228 = vmatmul.mubr.bf16.vlgmr.msra.gmra.mxu0 %v17_v28 }
  0xe2   :  { %v272_v37 = vpop.f32.mrf.mxu1  ;;  %v229_v40 = vpop.f32.mrf.mxu0 }
  0xe3   :  { %v273_v39 = vadd.f32 %v272_v37, %v63_v35  ;;  %v230_v41 = vadd.f32 %v229_v40, %v55_v36 }
  0xe4   :  { %v340_v42 = vpop.f32.mrf.mxu1  ;;  %v231_v43 = vpop.f32.mrf.mxu0 }
  0xe5   :  { %281 = vst [vmem:[%s502_s3 + $0x10] sm:$0xff] %v273_v39  ;;  %279 = vst [vmem:[%s502_s3] sm:$0xff] %v230_v41  ;;  %v232_v44 = vadd.f32 %v231_v43, %v59_v38 }
  0xe6   :  { %v275_v45 = vpop.f32.mrf.mxu1  ;;  %v233_v47 = vpop.f32.mrf.mxu0 }
  0xe7   :  { %v276_v46 = vadd.f32 %v275_v45, %v63_v35  ;;  %280 = vst [vmem:[%s502_s3 + $0x8] sm:$0xff] %v232_v44  ;;  %v234_v48 = vadd.f32 %v233_v47, %v55_v36 }
  0xe8   :  { %v341_v49 = vpop.f32.mrf.mxu1  ;;  %v235_v50 = vpop.f32.mrf.mxu0 }
  0xe9   :  { %284 = vst [vmem:[%s502_s3 + $0x28] sm:$0xff] %v276_v46  ;;  %282 = vst [vmem:[%s502_s3 + $0x18] sm:$0xff] %v234_v48  ;;  %v236_v51 = vadd.f32 %v235_v50, %v59_v38 }
  0xeb   :  { %283 = vst [vmem:[%s502_s3 + $0x20] sm:$0xff] %v236_v51 }

// kernel: transformer_forward.34
= control target key start
LH: loop header
LB: loop body
LE: loop exit
PB: predicated region body
PF: predicated region fallthrough
CT: control target
= control target key end

     0   :  { %s967_s15 = smov 0   ;;  %s1075_s0 = inlined_call_operand.vmem [shape: f32[2,8,128], index: 0, kind: input, shape index: {}]   ;;  %s1076_s1 = inlined_call_operand.vmem [shape: f32[2,8,128], index: 1, kind: input, shape index: {}]   ;;  %s1077_s2 = inlined_call_operand.vmem [shape: f32[2,8,128], index: 2, kind: input, shape index: {}]   ;;  %s1078_s3 = inlined_call_operand.vmem [shape: f32[2,1,8], index: 3, kind: input, shape index: {}]   ;;  %s1079_s4 = inlined_call_operand.vmem [shape: f32[2,8,128], index: 4, kind: output, shape index: {}]  }
   0x1 LB: > { %s814_s16 = sadd.s32 4294967295, %s934_s15   ;;  %p818_p0 = scmp.ge.s32.totalorder %s934_s15, 1  ;;  %s934_s15 = sphi %s967_s15, %s14_s15  }
   0x2   : > { %p187_p1 = scmp.lt.s32.totalorder %s934_s15, 3 }
   0x4   : > { %p188_p2 = pnand %p818_p0, %p187_p1 }
   0x5   : > { %p222_p3 = scmp.lt.s32.totalorder (!%p188_p2), %s814_s16, 1  ;;  %s939_s27 = smov (!%p188_p2), 96  }
   0x6   : > { %191 = sbr.rel (%p188_p2) target bundleno = 1418 (0x58a), region = 36  ;;  %s940_s28 = smov (!%p188_p2), 64  }
   0x7   : > { %s941_s29 = smov (!%p188_p2), 32  }
   0xb   : > { %v936_v0 = vmov 0.0   ;;  %vm937_vm0 = vmmov 0   ;;  %s1081_s16 = smov (!%p222_p3, %s814_s16), 1  ;;  %vm262_vm1 = vcmask 261120   ;;  %v252_v6 = vlaneseq }
   0xc   : > { %850 = vmatprep.subr.bf16.mxu0 %v936_v0  ;;  %852 = vmatprep.mubr.msk.bf16.mxu0 %vm937_vm0, %v936_v0  ;;  %s981_s17 = sshll.u32 %s1081_s16, 3  ;;  %s236_s26 = scalar_lea.vmem %s1078_s3, %s1081_s16  ;;  %v938_v10 = vmov -1e+09   ;;  %vm311_vm3 = vcmask 64512   ;;  %vm327_vm4 = vcmask 1043456   ;;  %vm723_vm5 = vcmask 523264  }
   0xd   : > { %856 = vmatprep.subr.bf16.mxu1 %v936_v0  ;;  %858 = vmatprep.mubr.msk.bf16.mxu1 %vm937_vm0, %v936_v0  ;;  %s229_s20 = scalar_lea.vmem %s1076_s1, %s981_s17  ;;  %s225_s23 = scalar_lea.vmem %s1075_s0, %s981_s17  ;;  %v253_v7 = vshrl.u32 %v252_v6, 7  ;;  %v255_v8 = vand.u32 127, %v252_v6  ;;  %v823_v9 = vld [vmem:[%s236_s26] ss:$0 sm:$0xff]  ;;  %vm725_vm6 = vcmask 785408  }
   0xe   : > { %v243_v1 = vld [vmem:[%s229_s20] sm:$0xff]  ;;  %s233_s6 = scalar_lea.vmem %s1077_s2, %s981_s17  ;;  %s240_s9 = scalar_lea.vmem %s1079_s4, %s981_s17 }
   0xf   : > { %v260_v2 = vpack.c.bf16 %v243_v1, %v243_v1  ;;  %v242_v4 = vld [vmem:[%s225_s23] sm:$0xff]  ;;  %vm256_vm2 = vcmp.ge.s32.totalorder %v253_v7, %v255_v8 }
  0x10   : > { %v259_v5 = vpack.c.bf16 %v242_v4, %v242_v4  ;;  %v257_v11 = vsel %vm256_vm2, 0.0, %v938_v10  ;;  %v244_v25 = vld [vmem:[%s233_s6] sm:$0xff] }
  0x11   : > { %v267_v3 = vsel %vm262_vm1, %v260_v2, 0  ;;  %v999_v12 = vadd.f32 %v823_v9, %v257_v11  ;;  %375 = vrot.lane.b32.xlu1 %v260_v2, %s939_s27  ;;  %v1013_v26 = vpack.c.bf16 %v244_v25, %v244_v25 }
  0x12   : > { %851 = vmatpush3.bf16.xpose.msra.mxu0 %v267_v3 }
  0x13   : > { %868 = vmatprep.subr.bf16.mxu0 %v936_v0  ;;  %v329_v27 = vsel %vm327_vm4, %v1013_v26, 0 }
  0x14   : > { %857 = vmatpush3.bf16.msra.mxu1 %v329_v27 }
  0x15   : > { %372 = vrot.lane.b32.xlu1 %v259_v5, %s939_s27  ;;  %862 = vmatprep.subr.bf16.mxu1 %v936_v0 }
  0x19   : > { %853 = vmatmul.mubr.msk.bf16.vlgmr.msra.gmra.mxu0 %vm262_vm1, %v259_v5  ;;  %486 = vrot.lane.b32.xlu1 %v259_v5, %s940_s28 }
  0x1a   : > { %870 = vmatprep.mubr.msk.bf16.mxu0 %vm937_vm0, %v936_v0 }
  0x1d   : > { %600 = vrot.lane.b32.xlu1 %v260_v2, %s941_s29 }
  0x21   : > { %598 = vrot.lane.b32.xlu1 %v259_v5, %s941_s29 }
  0x83   : > { %v376_v30 = vpop.permute.xlu1 %375 }
  0x84   : > { %v381_v32 = vsel %vm262_vm1, %v376_v30, 0 }
  0x87   : > { %v373_v34 = vpop.permute.xlu1 %372 }
  0x8b   : > { %v487_v36 = vpop.permute.xlu1 %486 }
  0x8f   : > { %v601_v38 = vpop.permute.xlu1 %600 }
  0x90   : > { %v606_v39 = vsel %vm262_vm1, %v601_v38, 0 }
  0x93   : > { %v599_v40 = vpop.permute.xlu1 %598 }
  0xd9   : > { %v303_v13 = vpop.f32.mrf.mxu0 }
  0xda   : > { %v309_v14 = vmul.f32 0.17677669, %v303_v13 }
  0xdb   : > { %v854_v15 = vpop.f32.mrf.mxu0 }
  0xdc   : > { %v310_v16 = vadd.f32 %v309_v14, %v999_v12 }
  0xdd   : > { %v306_v17 = vpop.f32.mrf.mxu0 }
  0xde   : > { %v312_v18 = vsel %vm311_vm3, %v310_v16, -inf }
  0xdf   : > { %313 = vmax.xlane.f32.xlu0 %v312_v18  ;;  %v855_v19 = vpop.f32.mrf.mxu0 }
 0x168   : > { %v314_v20 = vpop.xlane.xlu0 %313 }
 0x169   : > { %v315_v21 = vsub.f32 %v310_v16, %v314_v20 }
 0x16b   : > { %v316_v22 = vmul.f32 1.442695, %v315_v21 }
 0x16d   : > { %912 = vpow2.f32 %v316_v22 }
 0x17a   : > { %v913_v23 = vpop.eup %912 }
 0x17b   : > { %v318_v24 = vsel %vm311_vm3, %v913_v23, 0.0 }
 0x17c   : > { %319 = vadd.xlane.f32.xlu0 %v318_v24 }
 0x192   : > { %488 = vrot.lane.b32.xlu0 %v260_v2, %s940_s28 }
 0x205   : > { %v320_v28 = vpop.xlane.xlu0 %319 }
 0x206   : > { %914 = vrcp.f32 %v320_v28 }
 0x209   : > { %v489_v35 = vpop.permute.xlu0 %488 }
 0x20a   : > { %v494_v37 = vsel %vm262_vm1, %v489_v35, 0 }
 0x213   : > { %v915_v29 = vpop.eup %914 }
 0x214   : > { %v322_v31 = vmul.f32 %v915_v29, %v913_v23 }
 0x216   : > { %v323_v33 = vpack.c.bf16 %v322_v31, %v322_v31 }
 0x218   : > { %859 = vmatmul.mubr.msk.bf16.vlgmr.msra.gmra.mxu1 %vm311_vm3, %v323_v33 }
 0x219   : > { %863 = vmatpush3.bf16.xpose.msra.mxu1 %v381_v32  ;;  %864 = vmatprep.mubr.msk.bf16.mxu1 %vm937_vm0, %v936_v0 }
 0x21a   : > { %874 = vmatprep.subr.bf16.mxu1 %v936_v0 }
 0x220   : > { %865 = vmatmul.mubr.msk.bf16.vlgmr.msra.gmra.mxu1 %vm262_vm1, %v373_v34 }
 0x221   : > { %875 = vmatpush3.bf16.xpose.msra.mxu1 %v494_v37  ;;  %876 = vmatprep.mubr.msk.bf16.mxu1 %vm937_vm0, %v936_v0 }
 0x222   : > { %886 = vmatprep.subr.bf16.mxu1 %v936_v0 }
 0x228   : > { %877 = vmatmul.mubr.msk.bf16.vlgmr.msra.gmra.mxu1 %vm262_vm1, %v487_v36 }
 0x229   : > { %887 = vmatpush3.bf16.xpose.msra.mxu1 %v606_v39  ;;  %888 = vmatprep.mubr.msk.bf16.mxu1 %vm937_vm0, %v936_v0 }
 0x230   : > { %889 = vmatmul.mubr.msk.bf16.vlgmr.msra.gmra.mxu1 %vm262_vm1, %v599_v40 }
 0x2d8   : > { %v1034_v41 = vpop.f32.mrf.mxu1 }
 0x2da   : > { %v860_v42 = vpop.f32.mrf.mxu1 }
 0x2dc   : > { %v368_v43 = vpop.f32.mrf.mxu1 }
 0x2de   : > { %v861_v44 = vpop.f32.mrf.mxu1 }
 0x2e0   : > { %v417_v45 = vpop.f32.mrf.mxu1 }
 0x2e1   : > { %v423_v46 = vmul.f32 0.17677669, %v417_v45 }
 0x2e2   : > { %v866_v47 = vpop.f32.mrf.mxu1 }
 0x2e3   : > { %v424_v48 = vadd.f32 %v423_v46, %v999_v12 }
 0x2e4   : > { %v420_v49 = vpop.f32.mrf.mxu1 }
 0x2e5   : > { %v425_v50 = vsel %vm311_vm3, %v424_v48, -inf }
 0x2e6   : > { %426 = vmax.xlane.f32.xlu1 %v425_v50  ;;  %v867_v51 = vpop.f32.mrf.mxu1 }
 0x2e8   : > { %v530_v52 = vpop.f32.mrf.mxu1 }
 0x2e9   : > { %v536_v53 = vmul.f32 0.17677669, %v530_v52 }
 0x2ea   : > { %v878_v54 = vpop.f32.mrf.mxu1 }
 0x2eb   : > { %v537_v55 = vadd.f32 %v536_v53, %v999_v12 }
 0x2ec   : > { %v533_v56 = vpop.f32.mrf.mxu1 }
 0x2ed   : > { %v538_v57 = vsel %vm311_vm3, %v537_v55, -inf }
 0x2ee   : > { %539 = vmax.xlane.f32.xlu0 %v538_v57  ;;  %v879_v58 = vpop.f32.mrf.mxu1 }
 0x2f0   : > { %v642_v59 = vpop.f32.mrf.mxu1 }
 0x2f1   : > { %v648_v60 = vmul.f32 0.17677669, %v642_v59 }
 0x2f2   : > { %v890_v61 = vpop.f32.mrf.mxu1 }
 0x2f3   : > { %v649_v62 = vadd.f32 %v648_v60, %v999_v12 }
 0x2f4   : > { %v645_v63 = vpop.f32.mrf.mxu1 }
 0x2f5   : > { %v650_v1 = vsel %vm311_vm3, %v649_v62, -inf }
 0x2f6   : > { %651 = vmax.xlane.f32.xlu1 %v650_v1  ;;  %v891_v2 = vpop.f32.mrf.mxu1 }
 0x36f   : > { %v427_v3 = vpop.xlane.xlu1 %426 }
 0x370   : > { %v428_v4 = vsub.f32 %v424_v48, %v427_v3 }
 0x372   : > { %v429_v5 = vmul.f32 1.442695, %v428_v4 }
 0x374   : > { %916 = vpow2.f32 %v429_v5 }
 0x377   : > { %v540_v6 = vpop.xlane.xlu0 %539 }
 0x378   : > { %v541_v7 = vsub.f32 %v537_v55, %v540_v6 }
 0x37a   : > { %v542_v8 = vmul.f32 1.442695, %v541_v7 }
 0x37c   : > { %918 = vpow2.f32 %v542_v8 }
 0x37f   : > { %v652_v13 = vpop.xlane.xlu1 %651 }
 0x380   : > { %v653_v14 = vsub.f32 %v649_v62, %v652_v13 }
 0x381   : > { %v917_v9 = vpop.eup %916 }
 0x382   : > { %v431_v10 = vsel %vm311_vm3, %v917_v9, 0.0  ;;  %v654_v15 = vmul.f32 1.442695, %v653_v14 }
 0x383   : > { %432 = vadd.xlane.f32.xlu1 %v431_v10 }
 0x384   : > { %920 = vpow2.f32 %v654_v15 }
 0x389   : > { %v919_v11 = vpop.eup %918 }
 0x38a   : > { %v544_v12 = vsel %vm311_vm3, %v919_v11, 0.0 }
 0x38b   : > { %545 = vadd.xlane.f32.xlu0 %v544_v12 }
 0x391   : > { %v921_v16 = vpop.eup %920 }
 0x392   : > { %v656_v17 = vsel %vm311_vm3, %v921_v16, 0.0 }
 0x394   : > { %550 = vrot.lane.b32.xlu1 %v1013_v26, %s940_s28 }
 0x3a1   : > { %438 = vrot.lane.b32.xlu0 %v1013_v26, %s939_s27 }
 0x3b8   : > { %657 = vadd.xlane.f32.xlu1 %v656_v17 }
 0x3c9   : > { %662 = vrot.lane.b32.xlu1 %v1013_v26, %s941_s29 }
 0x40c   : > { %v433_v18 = vpop.xlane.xlu1 %432 }
 0x40d   : > { %922 = vrcp.f32 %v433_v18 }
 0x410   : > { %v551_v24 = vpop.permute.xlu1 %550 }
 0x411   : > { %v556_v27 = vsel %vm327_vm4, %v551_v24, 0 }
 0x414   : > { %v546_v19 = vpop.xlane.xlu0 %545 }
 0x415   : > { %924 = vrcp.f32 %v546_v19 }
 0x418   : > { %v439_v20 = vpop.permute.xlu0 %438 }
 0x419   : > { %v444_v21 = vsel %vm327_vm4, %v439_v20, 0 }
 0x41a   : > { %v923_v22 = vpop.eup %922  ;;  %869 = vmatpush3.bf16.msra.mxu0 %v444_v21 }
 0x41b   : > { %880 = vmatprep.subr.bf16.mxu0 %v936_v0  ;;  %v435_v23 = vmul.f32 %v923_v22, %v917_v9 }
 0x41d   : > { %v436_v25 = vpack.c.bf16 %v435_v23, %v435_v23 }
 0x41f   : > { %871 = vmatmul.mubr.msk.bf16.vlgmr.msra.gmra.mxu0 %vm311_vm3, %v436_v25 }
 0x420   : > { %881 = vmatpush3.bf16.msra.mxu0 %v556_v27  ;;  %882 = vmatprep.mubr.msk.bf16.mxu0 %vm937_vm0, %v936_v0 }
 0x421   : > { %892 = vmatprep.subr.bf16.mxu0 %v936_v0 }
 0x422   : > { %v925_v26 = vpop.eup %924 }
 0x423   : > { %v548_v28 = vmul.f32 %v925_v26, %v919_v11 }
 0x425   : > { %v549_v29 = vpack.c.bf16 %v548_v28, %v548_v28 }
 0x427   : > { %883 = vmatmul.mubr.msk.bf16.vlgmr.msra.gmra.mxu0 %vm311_vm3, %v549_v29 }
 0x428   : > { %894 = vmatprep.mubr.msk.bf16.mxu0 %vm937_vm0, %v936_v0 }
 0x441   : > { %v658_v30 = vpop.xlane.xlu1 %657 }
 0x442   : > { %926 = vrcp.f32 %v658_v30 }
 0x445   : > { %v663_v31 = vpop.permute.xlu1 %662 }
 0x446   : > { %v668_v32 = vsel %vm327_vm4, %v663_v31, 0 }
 0x447   : > { %893 = vmatpush3.bf16.msra.mxu0 %v668_v32 }
 0x44f   : > { %v927_v33 = vpop.eup %926 }
 0x450   : > { %v660_v34 = vmul.f32 %v927_v33, %v921_v16 }
 0x452   : > { %v661_v35 = vpack.c.bf16 %v660_v34, %v660_v34 }
 0x454   : > { %895 = vmatmul.mubr.msk.bf16.vlgmr.msra.gmra.mxu0 %vm311_vm3, %v661_v35 }
 0x4df   : > { %v480_v36 = vpop.f32.mrf.mxu0 }
 0x4e0   : > { %711 = vrot.lane.b32.xlu0 %v480_v36, %s941_s29 }
 0x4e1   : > { %v872_v37 = vpop.f32.mrf.mxu0 }
 0x4e3   : > { %v483_v38 = vpop.f32.mrf.mxu0 }
 0x4e5   : > { %v873_v39 = vpop.f32.mrf.mxu0 }
 0x4e7   : > { %v592_v40 = vpop.f32.mrf.mxu0 }
 0x4e8   : > { %715 = vrot.lane.b32.xlu1 %v592_v40, %s940_s28 }
 0x4e9   : > { %v884_v0 = vpop.f32.mrf.mxu0 }
 0x4eb   : > { %v595_v42 = vpop.f32.mrf.mxu0 }
 0x4ed   : > { %v885_v43 = vpop.f32.mrf.mxu0 }
 0x514   : > { %v704_v44 = vpop.f32.mrf.mxu0 }
 0x515   : > { %719 = vrot.lane.b32.xlu0 %v704_v44, %s939_s27 }
 0x516   : > { %v896_v45 = vpop.f32.mrf.mxu0 }
 0x518   : > { %v707_v46 = vpop.f32.mrf.mxu0 }
 0x51a   : > { %v897_v47 = vpop.f32.mrf.mxu0 }
 0x552   : > { %v712_v48 = vpop.permute.xlu0 %711 }
 0x553   : > { %v722_v50 = vsel %vm262_vm1, %v1034_v41, %v712_v48 }
 0x55a   : > { %v716_v49 = vpop.permute.xlu1 %715 }
 0x55b   : > { %v724_v51 = vsel %vm723_vm5, %v722_v50, %v716_v49 }
 0x587   : > { %v720_v52 = vpop.permute.xlu0 %719 }
 0x588   : > { %v726_v53 = vsel %vm725_vm6, %v724_v51, %v720_v52 }
 0x589   : > { %727 = vst [vmem:[%s240_s9] sm:$0xff] %v726_v53 }
 0x58a PF: > { %s14_s15 = sadd.s32 1, %s934_s15  }
 0x58b   : > { %p11_p4 = scmp.ge.s32.totalorder %s14_s15, 4  }
 0x58d   :  { %13 = sbr.rel (!%p11_p4) target bundleno = 1 (0x1), region = 75 }

// kernel: transformer_forward.37
= control target key start
LH: loop header
LB: loop body
LE: loop exit
PB: predicated region body
PF: predicated region fallthrough
CT: control target
= control target key end

     0   :  { %v218_v1 = vmov 0   ;;  %v36_v20 = vlaneseq  ;;  %s308_s1 = inlined_call_operand.vmem [shape: bf16[128,256], index: 1, kind: input, shape index: {}]   ;;  %s309_s0 = inlined_call_operand.vmem [shape: f32[16,128], index: 0, kind: input, shape index: {}]   ;;  %s310_s2 = inlined_call_operand.vmem [shape: f32[1,256], index: 2, kind: input, shape index: {}]   ;;  %s311_s3 = inlined_call_operand.vmem [shape: f32[16,256], index: 3, kind: output, shape index: {}]  }
   0x1   :  { %v194_v0 = vld [vmem:[%s308_s1 + $0x74] ss:$8 sps:$4 sm:$0xff]   ;;  %158 = vmatprep.mubr.bf16.mxu0 %v218_v1  ;;  %v196_v2 = vld [vmem:[%s308_s1 + $0x70] ss:$8 sps:$4 sm:$0xff]   ;;  %v197_v3 = vld [vmem:[%s308_s1 + $0x64] ss:$8 sps:$4 sm:$0xff]  }
   0x2   :  { %126 = vmatprep.subr.bf16.mxu0 %v194_v0  ;;  %v199_v4 = vld [vmem:[%s308_s1 + $0x60] ss:$8 sps:$4 sm:$0xff]   ;;  %v200_v5 = vld [vmem:[%s308_s1 + $0x54] ss:$8 sps:$4 sm:$0xff]   ;;  %v202_v6 = vld [vmem:[%s308_s1 + $0x50] ss:$8 sps:$4 sm:$0xff]  }
   0x3   :  { %127 = vmatpush1.bf16.msra.mxu0 %v196_v2  ;;  %v203_v7 = vld [vmem:[%s308_s1 + $0x44] ss:$8 sps:$4 sm:$0xff]   ;;  %v205_v8 = vld [vmem:[%s308_s1 + $0x40] ss:$8 sps:$4 sm:$0xff]   ;;  %v206_v9 = vld [vmem:[%s308_s1 + $0x34] ss:$8 sps:$4 sm:$0xff]  }
   0x4   :  { %128 = vmatprep.subr.bf16.mxu0 %v197_v3  ;;  %v208_v10 = vld [vmem:[%s308_s1 + $0x30] ss:$8 sps:$4 sm:$0xff]   ;;  %v209_v11 = vld [vmem:[%s308_s1 + $0x24] ss:$8 sps:$4 sm:$0xff]   ;;  %v211_v12 = vld [vmem:[%s308_s1 + $0x20] ss:$8 sps:$4 sm:$0xff]  }
   0x5   :  { %v212_v13 = vld [vmem:[%s308_s1 + $0x14] ss:$8 sps:$4 sm:$0xff]   ;;  %v214_v14 = vld [vmem:[%s308_s1 + $0x10] ss:$8 sps:$4 sm:$0xff]   ;;  %v215_v15 = vld [vmem:[%s308_s1 + $0x4] ss:$8 sps:$4 sm:$0xff]  }
   0x6   :  { %v217_v16 = vld [vmem:[%s308_s1] ss:$8 sps:$4 sm:$0xff]   ;;  %v37_v21 = vshrl.u32 %v36_v20, 7 }
   0x7   :  { %129 = vmatpush1.bf16.msra.mxu0 %v199_v4  ;;  %v15_v17 = vld [vmem:[%s309_s0] sm:$0xff]  ;;  %v16_v18 = vld [vmem:[%s309_s0 + $0x8] sm:$0xff] }
   0x8   :  { %130 = vmatprep.subr.bf16.mxu0 %v200_v5  ;;  %v17_v19 = vpack.c.bf16 %v16_v18, %v15_v17  ;;  %v38_v22 = vsub.s32 0, %v37_v21  ;;  %v34_v23 = vld [vmem:[%s310_s2] sm:$0x3]  ;;  %v42_v24 = vsub.s32 1, %v37_v21 }
   0xa   :  { %v39_v25 = vrot.slane %v34_v23, %v38_v22  ;;  %v43_v26 = vrot.slane %v34_v23, %v42_v24 }
   0xb   :  { %131 = vmatpush1.bf16.msra.mxu0 %v202_v6 }
   0xc   :  { %132 = vmatprep.subr.bf16.mxu0 %v203_v7 }
   0xf   :  { %133 = vmatpush1.bf16.msra.mxu0 %v205_v8 }
  0x10   :  { %134 = vmatprep.subr.bf16.mxu0 %v206_v9 }
  0x13   :  { %135 = vmatpush1.bf16.msra.mxu0 %v208_v10 }
  0x14   :  { %136 = vmatprep.subr.bf16.mxu0 %v209_v11 }
  0x17   :  { %137 = vmatpush1.bf16.msra.mxu0 %v211_v12 }
  0x18   :  { %138 = vmatprep.subr.bf16.mxu0 %v212_v13 }
  0x1b   :  { %139 = vmatpush1.bf16.msra.mxu0 %v214_v14 }
  0x1c   :  { %140 = vmatprep.subr.bf16.mxu0 %v215_v15 }
  0x1f   :  { %141 = vmatpush1.bf16.msra.mxu0 %v217_v16 }
  0x22   :  { %159 = vmatmul.mubr.bf16.vlgmr.msra.gmra.mxu0 %v17_v19 }
  0xe2   :  { %v160_v27 = vpop.f32.mrf.mxu0 }
  0xe3   :  { %v161_v28 = vadd.f32 %v160_v27, %v39_v25 }
  0xe4   :  { %v162_v29 = vpop.f32.mrf.mxu0 }
  0xe5   :  { %169 = vst [vmem:[%s311_s3] sm:$0xff] %v161_v28  ;;  %v163_v30 = vadd.f32 %v162_v29, %v43_v26 }
  0xe6   :  { %v164_v31 = vpop.f32.mrf.mxu0 }
  0xe7   :  { %170 = vst [vmem:[%s311_s3 + $0x8] sm:$0xff] %v163_v30  ;;  %v165_v32 = vadd.f32 %v164_v31, %v39_v25 }
  0xe8   :  { %v166_v33 = vpop.f32.mrf.mxu0 }
  0xe9   :  { %171 = vst [vmem:[%s311_s3 + $0x10] sm:$0xff] %v165_v32  ;;  %v167_v34 = vadd.f32 %v166_v33, %v43_v26 }
  0xeb   :  { %172 = vst [vmem:[%s311_s3 + $0x18] sm:$0xff] %v167_v34 }

// kernel: transformer_forward.49
= control target key start
LH: loop header
LB: loop body
LE: loop exit
PB: predicated region body
PF: predicated region fallthrough
CT: control target
= control target key end

     0   :  { %v222_v1 = vmov 0.0   ;;  %vm223_vm0 = vmmov 0   ;;  %s283_s0 = inlined_call_operand.vmem [shape: f32[16,128], index: 0, kind: input, shape index: {}]   ;;  %s284_s1 = inlined_call_operand.vmem [shape: bf16[128,128], index: 1, kind: input, shape index: {}]   ;;  %s285_s2 = inlined_call_operand.vmem [shape: f32[1,128], index: 2, kind: input, shape index: {}]   ;;  %s286_s3 = inlined_call_operand.hbm [shape: f32[16,128], index: 3, kind: output, shape index: {}]  }
   0x1   :  { %v192_v0 = vld [vmem:[%s284_s1 + $0x38] sm:$0xff]   ;;  %167 = vmatprep.subr.bf16.mxu0 %v222_v1  ;;  %v193_v2 = vld [vmem:[%s284_s1 + $0x30] sm:$0xff]   ;;  %183 = vmatprep.mubr.msk.bf16.mxu0 %vm223_vm0, %v222_v1  ;;  %v194_v3 = vld [vmem:[%s284_s1 + $0x28] sm:$0xff]  }
   0x2   :  { %168 = vmatpush3.bf16.msra.mxu0 %v192_v0 }
   0x3   :  { %169 = vmatprep.subr.bf16.mxu0 %v222_v1 }
   0x6   :  { %170 = vmatpush3.bf16.msra.mxu0 %v193_v2 }
   0x7   :  { %171 = vmatprep.subr.bf16.mxu0 %v222_v1 }
   0x8   :  { %8 = vsyncpa [#allocation3], 0  ;;  %v195_v4 = vld [vmem:[%s284_s1 + $0x20] sm:$0xff]   ;;  %v196_v5 = vld [vmem:[%s284_s1 + $0x18] sm:$0xff]   ;;  %s224_s7 = smov [#allocation2]  }
   0x9   :  { %v197_v6 = vld [vmem:[%s284_s1 + $0x10] sm:$0xff]   ;;  %v198_v7 = vld [vmem:[%s284_s1 + $0x8] sm:$0xff]   ;;  %v199_v8 = vld [vmem:[%s284_s1] sm:$0xff]   ;;  %s138_s1 = sshll.u32 %s224_s7, 4  ;;  %s139_s1 = int_to_ptr.vmem [resolvable:$true] %s138_s1 }
   0xa   :  { %172 = vmatpush3.bf16.msra.mxu0 %v194_v3  ;;  %v16_v9 = vld [vmem:[%s283_s0] sm:$0xff]  ;;  %v17_v10 = vld [vmem:[%s283_s0 + $0x8] sm:$0xff]  ;;  %s200_s0 = scalar_lea.vmem %s139_s1, 256  ;;  %p205_p1 = scmp.lt.s32.totalorder %s139_s1, %s139_s1 }
   0xb   :  { %173 = vmatprep.subr.bf16.mxu0 %v222_v1  ;;  %v18_v11 = vpack.c.bf16 %v17_v10, %v16_v9  ;;  %v149_v12 = vld [vmem:[%s285_s2] ss:$0 sm:$0xff]  ;;  %p201_p0 = scmp.ne.s32.totalorder %s139_s1, %s200_s0  ;;  %p206_p2 = scmp.lt.s32.totalorder %s200_s0, %s200_s0 }
   0xd   :  { %p207_p3 = por %p206_p2, %p205_p1 }
   0xe   :  { %174 = vmatpush3.bf16.msra.mxu0 %v195_v4 }
   0xf   :  { %175 = vmatprep.subr.bf16.mxu0 %v222_v1  ;;  %p208_p4 = pnand %p207_p3, %p201_p0 }
  0x12   :  { %176 = vmatpush3.bf16.msra.mxu0 %v196_v5 }
  0x13   :  { %177 = vmatprep.subr.bf16.mxu0 %v222_v1 }
  0x16   :  { %178 = vmatpush3.bf16.msra.mxu0 %v197_v6 }
  0x17   :  { %179 = vmatprep.subr.bf16.mxu0 %v222_v1 }
  0x1a   :  { %180 = vmatpush3.bf16.msra.mxu0 %v198_v7 }
  0x1b   :  { %181 = vmatprep.subr.bf16.mxu0 %v222_v1 }
  0x1e   :  { %182 = vmatpush3.bf16.msra.mxu0 %v199_v8 }
  0x21   :  { %184 = vmatmul.mubr.bf16.vlgmr.msra.gmra.mxu0 %v18_v11 }
  0xe1   :  { %v124_v13 = vpop.f32.mrf.mxu0 }
  0xe2   :  { %v125_v14 = vadd.f32 %v149_v12, %v124_v13 }
  0xe3   :  { %v185_v15 = vpop.f32.mrf.mxu0 }
  0xe4   :  { %131 = vst [vmem:[#allocation2] sm:$0xff] %v125_v14 }
  0xe5   :  { %v127_v16 = vpop.f32.mrf.mxu0 }
  0xe6   :  { %v128_v17 = vadd.f32 %v149_v12, %v127_v16 }
  0xe7   :  { %v186_v18 = vpop.f32.mrf.mxu0 }
  0xe8   :  { %132 = vst [vmem:[#allocation2 + $0x8] sm:$0xff] %v128_v17 }
  0xe9   :  { %211 = shalt.err (!%p208_p4)
}
  0xea   :  { %s225_s8 = smov 128   ;;  %s226_s2 = smov 8  }
  0xeb   :  { %144 = dma.vmem_to_hbm [thread:$0]  %s139_s1, 256, %s286_s3, [#allocation3], %s225_s8, %s225_s8, %s226_s2  }
  0xec   :  { %220 = dma.done.wait [#allocation3], 256  }
  0xed   :  { %221 = vsyncadd [#allocation3], 4294967040 }
  0xee   :  { %148 = vsyncpa [#allocation3], 1 }

// kernel: transformer_forward.28
= control target key start
LH: loop header
LB: loop body
LE: loop exit
PB: predicated region body
PF: predicated region fallthrough
CT: control target
= control target key end

     0   :  { %v514_v1 = vmov 0   ;;  %v48_v36 = vlaneseq  ;;  %s675_s1 = inlined_call_operand.vmem [shape: bf16[128,256], index: 1, kind: input, shape index: {}]   ;;  %s676_s3 = inlined_call_operand.vmem [shape: bf16[256,128], index: 3, kind: input, shape index: {}]   ;;  %s677_s0 = inlined_call_operand.vmem [shape: f32[16,128], index: 0, kind: input, shape index: {}]   ;;  %s678_s2 = inlined_call_operand.vmem [shape: f32[1,256], index: 2, kind: input, shape index: {}]   ;;  %s679_s4 = inlined_call_operand.vmem [shape: f32[1,128], index: 4, kind: input, shape index: {}]   ;;  %s680_s5 = inlined_call_operand.vmem [shape: f32[1,128], index: 5, kind: input, shape index: {}]   ;;  %s681_s6 = inlined_call_operand.vmem [shape: f32[1,128], index: 6, kind: input, shape index: {}]   ;;  %s682_s7 = inlined_call_operand.vmem [shape: f32[16,128], index: 7, kind: output, shape index: {}]  }
   0x1   :  { %v470_v0 = vld [vmem:[%s675_s1 + $0x74] ss:$8 sps:$4 sm:$0xff]   ;;  %170 = vmatprep.mubr.bf16.mxu0 %v514_v1  ;;  %v472_v2 = vld [vmem:[%s675_s1 + $0x70] ss:$8 sps:$4 sm:$0xff]   ;;  %v473_v3 = vld [vmem:[%s675_s1 + $0x64] ss:$8 sps:$4 sm:$0xff]  }
   0x2   :  { %138 = vmatprep.subr.bf16.mxu0 %v470_v0  ;;  %v475_v4 = vld [vmem:[%s675_s1 + $0x60] ss:$8 sps:$4 sm:$0xff]   ;;  %v476_v5 = vld [vmem:[%s675_s1 + $0x54] ss:$8 sps:$4 sm:$0xff]   ;;  %v478_v6 = vld [vmem:[%s675_s1 + $0x50] ss:$8 sps:$4 sm:$0xff]  }
   0x3   :  { %139 = vmatpush1.bf16.msra.mxu0 %v472_v2  ;;  %v479_v7 = vld [vmem:[%s675_s1 + $0x44] ss:$8 sps:$4 sm:$0xff]   ;;  %v481_v8 = vld [vmem:[%s675_s1 + $0x40] ss:$8 sps:$4 sm:$0xff]   ;;  %v482_v9 = vld [vmem:[%s675_s1 + $0x34] ss:$8 sps:$4 sm:$0xff]  }
   0x4   :  { %140 = vmatprep.subr.bf16.mxu0 %v473_v3  ;;  %v494_v10 = vld [vmem:[%s676_s3 + $0x78] sm:$0xff]   ;;  %v485_v13 = vld [vmem:[%s675_s1 + $0x24] ss:$8 sps:$4 sm:$0xff]   ;;  %v496_v14 = vld [vmem:[%s676_s3 + $0x70] sm:$0xff]   ;;  %v49_v37 = vshrl.u32 %v48_v36, 7 }
   0x5   :  { %v484_v11 = vld [vmem:[%s675_s1 + $0x30] ss:$8 sps:$4 sm:$0xff]   ;;  %447 = vmatprep.subr.bf16.mxu1 %v494_v10  ;;  %v498_v16 = vld [vmem:[%s676_s3 + $0x68] sm:$0xff]   ;;  %v488_v18 = vld [vmem:[%s675_s1 + $0x14] ss:$8 sps:$4 sm:$0xff]  }
   0x6   :  { %v495_v12 = vld [vmem:[%s676_s3 + $0x38] sm:$0xff]   ;;  %v497_v15 = vld [vmem:[%s676_s3 + $0x30] sm:$0xff]   ;;  %v487_v17 = vld [vmem:[%s675_s1 + $0x20] ss:$8 sps:$4 sm:$0xff]   ;;  %v54_v38 = vsub.s32 1, %v49_v37  ;;  %v50_v39 = vsub.s32 0, %v49_v37 }
   0x7   :  { %141 = vmatpush1.bf16.msra.mxu0 %v475_v4  ;;  %448 = vmatpush3.bf16.msra.mxu1 %v495_v12  ;;  %v499_v19 = vld [vmem:[%s676_s3 + $0x28] sm:$0xff]   ;;  %v500_v20 = vld [vmem:[%s676_s3 + $0x60] sm:$0xff]   ;;  %v490_v21 = vld [vmem:[%s675_s1 + $0x10] ss:$8 sps:$4 sm:$0xff]  }
   0x8   :  { %142 = vmatprep.subr.bf16.mxu0 %v476_v5  ;;  %449 = vmatprep.subr.bf16.mxu1 %v496_v14  ;;  %v501_v22 = vld [vmem:[%s676_s3 + $0x20] sm:$0xff]   ;;  %v502_v24 = vld [vmem:[%s676_s3 + $0x58] sm:$0xff]   ;;  %v28_v27 = vld [vmem:[%s677_s0 + $0x8] sm:$0xff] }
   0x9   :  { %v491_v23 = vld [vmem:[%s675_s1 + $0x4] ss:$8 sps:$4 sm:$0xff]   ;;  %v493_v25 = vld [vmem:[%s675_s1] ss:$8 sps:$4 sm:$0xff]   ;;  %v503_v28 = vld [vmem:[%s676_s3 + $0x18] sm:$0xff]  }
   0xa   :  { %v27_v26 = vld [vmem:[%s677_s0] sm:$0xff]  ;;  %v504_v30 = vld [vmem:[%s676_s3 + $0x50] sm:$0xff]   ;;  %v506_v32 = vld [vmem:[%s676_s3 + $0x48] sm:$0xff]  }
   0xb   :  { %143 = vmatpush1.bf16.msra.mxu0 %v478_v6  ;;  %450 = vmatpush3.bf16.msra.mxu1 %v497_v15  ;;  %v29_v29 = vpack.c.bf16 %v28_v27, %v27_v26  ;;  %v505_v31 = vld [vmem:[%s676_s3 + $0x10] sm:$0xff]   ;;  %v507_v33 = vld [vmem:[%s676_s3 + $0x8] sm:$0xff]   ;;  %v508_v34 = vld [vmem:[%s676_s3 + $0x40] sm:$0xff]  }
   0xc   :  { %144 = vmatprep.subr.bf16.mxu0 %v479_v7  ;;  %451 = vmatprep.subr.bf16.mxu1 %v498_v16  ;;  %v509_v35 = vld [vmem:[%s676_s3] sm:$0xff]  }
   0xd   :  { %v46_v40 = vld [vmem:[%s678_s2] sm:$0x3] }
   0xe   :  { %v55_v42 = vrot.slane %v46_v40, %v54_v38  ;;  %v51_v43 = vrot.slane %v46_v40, %v50_v39  ;;  %v428_v58 = vld [vmem:[%s679_s4] ss:$0 sm:$0xff] }
   0xf   :  { %145 = vmatpush1.bf16.msra.mxu0 %v481_v8  ;;  %452 = vmatpush3.bf16.msra.mxu1 %v499_v19  ;;  %v445_v19 = vld [vmem:[%s680_s5] ss:$0 sm:$0xff] }
  0x10   :  { %146 = vmatprep.subr.bf16.mxu0 %v482_v9  ;;  %453 = vmatprep.subr.bf16.mxu1 %v500_v20 }
  0x13   :  { %147 = vmatpush1.bf16.msra.mxu0 %v484_v11  ;;  %454 = vmatpush3.bf16.msra.mxu1 %v501_v22 }
  0x14   :  { %148 = vmatprep.subr.bf16.mxu0 %v485_v13  ;;  %455 = vmatprep.subr.bf16.mxu1 %v502_v24 }
  0x17   :  { %149 = vmatpush1.bf16.msra.mxu0 %v487_v17  ;;  %456 = vmatpush3.bf16.msra.mxu1 %v503_v28 }
  0x18   :  { %150 = vmatprep.subr.bf16.mxu0 %v488_v18  ;;  %457 = vmatprep.subr.bf16.mxu1 %v504_v30 }
  0x1b   :  { %151 = vmatpush1.bf16.msra.mxu0 %v490_v21  ;;  %458 = vmatpush3.bf16.msra.mxu1 %v505_v31  ;;  %v446_v21 = vld [vmem:[%s681_s6] ss:$0 sm:$0xff] }
  0x1c   :  { %152 = vmatprep.subr.bf16.mxu0 %v491_v23  ;;  %459 = vmatprep.subr.bf16.mxu1 %v506_v32 }
  0x1f   :  { %153 = vmatpush1.bf16.msra.mxu0 %v493_v25  ;;  %460 = vmatpush3.bf16.msra.mxu1 %v507_v33 }
  0x20   :  { %461 = vmatprep.subr.bf16.mxu1 %v508_v34 }
  0x22   :  { %171 = vmatmul.mubr.bf16.vlgmr.msra.gmra.mxu0 %v29_v29 }
  0x23   :  { %462 = vmatpush3.bf16.msra.mxu1 %v509_v35 }
  0xe2   :  { %v172_v41 = vpop.f32.mrf.mxu0 }
  0xe3   :  { %v173_v48 = vadd.f32 %v172_v41, %v51_v43 }
  0xe4   :  { %v174_v44 = vpop.f32.mrf.mxu0 }
  0xe5   :  { %v175_v46 = vadd.f32 %v174_v44, %v55_v42  ;;  %v181_v54 = vmax.f32 %v173_v48, 0.0 }
  0xe6   :  { %v176_v45 = vpop.f32.mrf.mxu0 }
  0xe7   :  { %v177_v47 = vadd.f32 %v176_v45, %v51_v43  ;;  %v182_v52 = vmax.f32 %v175_v46, 0.0 }
  0xe8   :  { %v178_v49 = vpop.f32.mrf.mxu0 }
  0xe9   :  { %v179_v50 = vadd.f32 %v178_v49, %v55_v42  ;;  %v183_v51 = vmax.f32 %v177_v47, 0.0 }
  0xeb   :  { %v184_v53 = vmax.f32 %v179_v50, 0.0  ;;  %v185_v56 = vpack.c.bf16 %v183_v51, %v181_v54 }
  0xed   :  { %v186_v55 = vpack.c.bf16 %v184_v53, %v182_v52 }
  0xef   :  { %354 = vmatprep.mubr.bf16.mxu1 %v186_v55 }
  0xf0   :  { %355 = vmatmul.mubr.bf16.vlgmr.msra.gmra.mxu1 %v185_v56 }
 0x1b0   :  { %v463_v57 = vpop.f32.mrf.mxu1 }
 0x1b2   :  { %v464_v59 = vpop.f32.mrf.mxu1 }
 0x1b3   :  { %v465_v60 = vadd.f32 %v464_v59, %v463_v57 }
 0x1b4   :  { %v466_v61 = vpop.f32.mrf.mxu1 }
 0x1b5   :  { %v357_v62 = vadd.f32 %v465_v60, %v428_v58 }
 0x1b6   :  { %v467_v63 = vpop.f32.mrf.mxu1 }
 0x1b7   :  { %v468_v0 = vadd.f32 %v467_v63, %v466_v61  ;;  %v363_v1 = vadd.f32 %v357_v62, %v27_v26 }
 0x1b9   :  { %v360_v2 = vadd.f32 %v468_v0, %v428_v58  ;;  %365 = vadd.xlane.f32.xlu0 %v363_v1 }
 0x1bb   :  { %v364_v3 = vadd.f32 %v360_v2, %v28_v27 }
 0x1bd   :  { %367 = vadd.xlane.f32.xlu0 %v364_v3 }
 0x242   :  { %v366_v4 = vpop.xlane.xlu0 %365 }
 0x243   :  { %v370_v5 = vmul.f32 0.0078125, %v366_v4 }
 0x245   :  { %v372_v6 = vsub.f32 %v363_v1, %v370_v5 }
 0x246   :  { %v368_v7 = vpop.xlane.xlu0 %367 }
 0x247   :  { %v371_v8 = vmul.f32 0.0078125, %v368_v7  ;;  %v374_v9 = vmul.f32 %v372_v6, %v372_v6 }
 0x249   :  { %v373_v10 = vsub.f32 %v364_v3, %v371_v8  ;;  %376 = vadd.xlane.f32.xlu1 %v374_v9 }
 0x24b   :  { %v375_v11 = vmul.f32 %v373_v10, %v373_v10 }
 0x24d   :  { %378 = vadd.xlane.f32.xlu1 %v375_v11 }
 0x2d2   :  { %v377_v12 = vpop.xlane.xlu1 %376 }
 0x2d3   :  { %v380_v13 = vmul.f32 0.0078125, %v377_v12 }
 0x2d5   :  { %v382_v14 = vadd.f32 1e-05, %v380_v13 }
 0x2d6   :  { %v379_v15 = vpop.xlane.xlu1 %378 }
 0x2d7   :  { %510 = vrsqrt.f32 %v382_v14  ;;  %v381_v16 = vmul.f32 0.0078125, %v379_v15 }
 0x2d9   :  { %v383_v17 = vadd.f32 1e-05, %v381_v16 }
 0x2db   :  { %512 = vrsqrt.f32 %v383_v17 }
 0x2e4   :  { %v511_v18 = vpop.eup %510 }
 0x2e5   :  { %v386_v20 = vmul.f32 %v511_v18, %v372_v6 }
 0x2e7   :  { %v395_v22 = vmul.f32 %v445_v19, %v386_v20 }
 0x2e8   :  { %v513_v23 = vpop.eup %512 }
 0x2e9   :  { %v404_v24 = vadd.f32 %v446_v21, %v395_v22  ;;  %v387_v25 = vmul.f32 %v513_v23, %v373_v10 }
 0x2eb   :  { %406 = vst [vmem:[%s682_s7] sm:$0xff] %v404_v24  ;;  %v396_v26 = vmul.f32 %v445_v19, %v387_v25 }
 0x2ed   :  { %v405_v27 = vadd.f32 %v446_v21, %v396_v26 }
 0x2ef   :  { %407 = vst [vmem:[%s682_s7 + $0x8] sm:$0xff] %v405_v27 }

// kernel: transformer_forward.26
= control target key start
LH: loop header
LB: loop body
LE: loop exit
PB: predicated region body
PF: predicated region fallthrough
CT: control target
= control target key end

     0   :  { %s958_s15 = smov 0   ;;  %s1066_s0 = inlined_call_operand.vmem [shape: f32[2,8,128], index: 0, kind: input, shape index: {}]   ;;  %s1067_s1 = inlined_call_operand.vmem [shape: f32[2,8,128], index: 1, kind: input, shape index: {}]   ;;  %s1068_s2 = inlined_call_operand.vmem [shape: f32[2,8,128], index: 2, kind: input, shape index: {}]   ;;  %s1069_s3 = inlined_call_operand.vmem [shape: f32[2,1,8], index: 3, kind: input, shape index: {}]   ;;  %s1070_s4 = inlined_call_operand.vmem [shape: f32[2,8,128], index: 4, kind: output, shape index: {}]  }
   0x1 LB: > { %s807_s16 = sadd.s32 4294967295, %s926_s15   ;;  %p811_p0 = scmp.ge.s32.totalorder %s926_s15, 1  ;;  %s926_s15 = sphi %s958_s15, %s14_s15  }
   0x2   : > { %p187_p1 = scmp.lt.s32.totalorder %s926_s15, 3 }
   0x4   : > { %p188_p2 = pnand %p811_p0, %p187_p1 }
   0x5   : > { %p222_p3 = scmp.lt.s32.totalorder (!%p188_p2), %s807_s16, 1  ;;  %s930_s27 = smov (!%p188_p2), 96  }
   0x6   : > { %191 = sbr.rel (%p188_p2) target bundleno = 1418 (0x58a), region = 36  ;;  %s931_s28 = smov (!%p188_p2), 64  }
   0x7   : > { %s932_s29 = smov (!%p188_p2), 32  }
   0xb   : > { %v928_v0 = vmov 0.0   ;;  %vm929_vm0 = vmmov 0   ;;  %s1072_s16 = smov (!%p222_p3, %s807_s16), 1  ;;  %vm255_vm1 = vcmask 261120   ;;  %vm304_vm2 = vcmask 64512  }
   0xc   : > { %843 = vmatprep.subr.bf16.mxu0 %v928_v0  ;;  %845 = vmatprep.mubr.msk.bf16.mxu0 %vm929_vm0, %v928_v0  ;;  %s972_s17 = sshll.u32 %s1072_s16, 3  ;;  %s236_s26 = scalar_lea.vmem %s1069_s3, %s1072_s16  ;;  %vm320_vm3 = vcmask 1043456   ;;  %vm716_vm4 = vcmask 523264   ;;  %vm718_vm5 = vcmask 785408  }
   0xd   : > { %849 = vmatprep.subr.bf16.mxu1 %v928_v0  ;;  %851 = vmatprep.mubr.msk.bf16.mxu1 %vm929_vm0, %v928_v0  ;;  %s229_s20 = scalar_lea.vmem %s1067_s1, %s972_s17  ;;  %s225_s23 = scalar_lea.vmem %s1066_s0, %s972_s17  ;;  %v990_v7 = vld [vmem:[%s236_s26] ss:$0 sm:$0xff] }
   0xe   : > { %v243_v1 = vld [vmem:[%s229_s20] sm:$0xff]  ;;  %s233_s6 = scalar_lea.vmem %s1068_s2, %s972_s17  ;;  %s240_s9 = scalar_lea.vmem %s1070_s4, %s972_s17 }
   0xf   : > { %v253_v2 = vpack.c.bf16 %v243_v1, %v243_v1  ;;  %v242_v4 = vld [vmem:[%s225_s23] sm:$0xff] }
  0x10   : > { %v252_v5 = vpack.c.bf16 %v242_v4, %v242_v4  ;;  %v244_v19 = vld [vmem:[%s233_s6] sm:$0xff] }
  0x11   : > { %v260_v3 = vsel %vm255_vm1, %v253_v2, 0  ;;  %368 = vrot.lane.b32.xlu1 %v253_v2, %s930_s27  ;;  %v1004_v20 = vpack.c.bf16 %v244_v19, %v244_v19 }
  0x12   : > { %844 = vmatpush3.bf16.xpose.msra.mxu0 %v260_v3 }
  0x13   : > { %861 = vmatprep.subr.bf16.mxu0 %v928_v0  ;;  %v322_v21 = vsel %vm320_vm3, %v1004_v20, 0 }
  0x14   : > { %850 = vmatpush3.bf16.msra.mxu1 %v322_v21 }
  0x15   : > { %365 = vrot.lane.b32.xlu1 %v252_v5, %s930_s27  ;;  %855 = vmatprep.subr.bf16.mxu1 %v928_v0 }
  0x19   : > { %846 = vmatmul.mubr.msk.bf16.vlgmr.msra.gmra.mxu0 %vm255_vm1, %v252_v5  ;;  %479 = vrot.lane.b32.xlu1 %v252_v5, %s931_s28 }
  0x1a   : > { %863 = vmatprep.mubr.msk.bf16.mxu0 %vm929_vm0, %v928_v0 }
  0x1d   : > { %593 = vrot.lane.b32.xlu1 %v253_v2, %s932_s29 }
  0x21   : > { %591 = vrot.lane.b32.xlu1 %v252_v5, %s932_s29 }
  0x83   : > { %v369_v24 = vpop.permute.xlu1 %368 }
  0x84   : > { %v374_v26 = vsel %vm255_vm1, %v369_v24, 0 }
  0x87   : > { %v366_v28 = vpop.permute.xlu1 %365 }
  0x8b   : > { %v480_v30 = vpop.permute.xlu1 %479 }
  0x8f   : > { %v594_v32 = vpop.permute.xlu1 %593 }
  0x90   : > { %v599_v33 = vsel %vm255_vm1, %v594_v32, 0 }
  0x93   : > { %v592_v34 = vpop.permute.xlu1 %591 }
  0xd9   : > { %v296_v6 = vpop.f32.mrf.mxu0 }
  0xda   : > { %v302_v8 = vmul.f32 0.17677669, %v296_v6 }
  0xdb   : > { %v847_v9 = vpop.f32.mrf.mxu0 }
  0xdc   : > { %v303_v10 = vadd.f32 %v990_v7, %v302_v8 }
  0xdd   : > { %v299_v11 = vpop.f32.mrf.mxu0 }
  0xde   : > { %v305_v12 = vsel %vm304_vm2, %v303_v10, -inf }
  0xdf   : > { %306 = vmax.xlane.f32.xlu0 %v305_v12  ;;  %v848_v13 = vpop.f32.mrf.mxu0 }
 0x168   : > { %v307_v14 = vpop.xlane.xlu0 %306 }
 0x169   : > { %v308_v15 = vsub.f32 %v303_v10, %v307_v14 }
 0x16b   : > { %v309_v16 = vmul.f32 1.442695, %v308_v15 }
 0x16d   : > { %904 = vpow2.f32 %v309_v16 }
 0x17a   : > { %v905_v17 = vpop.eup %904 }
 0x17b   : > { %v311_v18 = vsel %vm304_vm2, %v905_v17, 0.0 }
 0x17c   : > { %312 = vadd.xlane.f32.xlu0 %v311_v18 }
 0x192   : > { %481 = vrot.lane.b32.xlu0 %v253_v2, %s931_s28 }
 0x205   : > { %v313_v22 = vpop.xlane.xlu0 %312 }
 0x206   : > { %906 = vrcp.f32 %v313_v22 }
 0x209   : > { %v482_v29 = vpop.permute.xlu0 %481 }
 0x20a   : > { %v487_v31 = vsel %vm255_vm1, %v482_v29, 0 }
 0x213   : > { %v907_v23 = vpop.eup %906 }
 0x214   : > { %v315_v25 = vmul.f32 %v907_v23, %v905_v17 }
 0x216   : > { %v316_v27 = vpack.c.bf16 %v315_v25, %v315_v25 }
 0x218   : > { %852 = vmatmul.mubr.msk.bf16.vlgmr.msra.gmra.mxu1 %vm304_vm2, %v316_v27 }
 0x219   : > { %856 = vmatpush3.bf16.xpose.msra.mxu1 %v374_v26  ;;  %857 = vmatprep.mubr.msk.bf16.mxu1 %vm929_vm0, %v928_v0 }
 0x21a   : > { %867 = vmatprep.subr.bf16.mxu1 %v928_v0 }
 0x220   : > { %858 = vmatmul.mubr.msk.bf16.vlgmr.msra.gmra.mxu1 %vm255_vm1, %v366_v28 }
 0x221   : > { %868 = vmatpush3.bf16.xpose.msra.mxu1 %v487_v31  ;;  %869 = vmatprep.mubr.msk.bf16.mxu1 %vm929_vm0, %v928_v0 }
 0x222   : > { %879 = vmatprep.subr.bf16.mxu1 %v928_v0 }
 0x228   : > { %870 = vmatmul.mubr.msk.bf16.vlgmr.msra.gmra.mxu1 %vm255_vm1, %v480_v30 }
 0x229   : > { %880 = vmatpush3.bf16.xpose.msra.mxu1 %v599_v33  ;;  %881 = vmatprep.mubr.msk.bf16.mxu1 %vm929_vm0, %v928_v0 }
 0x230   : > { %882 = vmatmul.mubr.msk.bf16.vlgmr.msra.gmra.mxu1 %vm255_vm1, %v592_v34 }
 0x2d8   : > { %v1025_v35 = vpop.f32.mrf.mxu1 }
 0x2da   : > { %v853_v36 = vpop.f32.mrf.mxu1 }
 0x2dc   : > { %v361_v37 = vpop.f32.mrf.mxu1 }
 0x2de   : > { %v854_v38 = vpop.f32.mrf.mxu1 }
 0x2e0   : > { %v410_v39 = vpop.f32.mrf.mxu1 }
 0x2e1   : > { %v416_v40 = vmul.f32 0.17677669, %v410_v39 }
 0x2e2   : > { %v859_v41 = vpop.f32.mrf.mxu1 }
 0x2e3   : > { %v417_v42 = vadd.f32 %v990_v7, %v416_v40 }
 0x2e4   : > { %v413_v43 = vpop.f32.mrf.mxu1 }
 0x2e5   : > { %v418_v44 = vsel %vm304_vm2, %v417_v42, -inf }
 0x2e6   : > { %419 = vmax.xlane.f32.xlu1 %v418_v44  ;;  %v860_v45 = vpop.f32.mrf.mxu1 }
 0x2e8   : > { %v523_v46 = vpop.f32.mrf.mxu1 }
 0x2e9   : > { %v529_v47 = vmul.f32 0.17677669, %v523_v46 }
 0x2ea   : > { %v871_v48 = vpop.f32.mrf.mxu1 }
 0x2eb   : > { %v530_v49 = vadd.f32 %v990_v7, %v529_v47 }
 0x2ec   : > { %v526_v50 = vpop.f32.mrf.mxu1 }
 0x2ed   : > { %v531_v51 = vsel %vm304_vm2, %v530_v49, -inf }
 0x2ee   : > { %532 = vmax.xlane.f32.xlu0 %v531_v51  ;;  %v872_v52 = vpop.f32.mrf.mxu1 }
 0x2f0   : > { %v635_v53 = vpop.f32.mrf.mxu1 }
 0x2f1   : > { %v641_v54 = vmul.f32 0.17677669, %v635_v53 }
 0x2f2   : > { %v883_v55 = vpop.f32.mrf.mxu1 }
 0x2f3   : > { %v642_v56 = vadd.f32 %v990_v7, %v641_v54 }
 0x2f4   : > { %v638_v57 = vpop.f32.mrf.mxu1 }
 0x2f5   : > { %v643_v58 = vsel %vm304_vm2, %v642_v56, -inf }
 0x2f6   : > { %644 = vmax.xlane.f32.xlu1 %v643_v58  ;;  %v884_v59 = vpop.f32.mrf.mxu1 }
 0x36f   : > { %v420_v60 = vpop.xlane.xlu1 %419 }
 0x370   : > { %v421_v61 = vsub.f32 %v417_v42, %v420_v60 }
 0x372   : > { %v422_v62 = vmul.f32 1.442695, %v421_v61 }
 0x374   : > { %908 = vpow2.f32 %v422_v62 }
 0x377   : > { %v533_v63 = vpop.xlane.xlu0 %532 }
 0x378   : > { %v534_v1 = vsub.f32 %v530_v49, %v533_v63 }
 0x37a   : > { %v535_v2 = vmul.f32 1.442695, %v534_v1 }
 0x37c   : > { %910 = vpow2.f32 %v535_v2 }
 0x37f   : > { %v645_v7 = vpop.xlane.xlu1 %644 }
 0x380   : > { %v646_v8 = vsub.f32 %v642_v56, %v645_v7 }
 0x381   : > { %v909_v3 = vpop.eup %908 }
 0x382   : > { %v424_v4 = vsel %vm304_vm2, %v909_v3, 0.0  ;;  %v647_v9 = vmul.f32 1.442695, %v646_v8 }
 0x383   : > { %425 = vadd.xlane.f32.xlu1 %v424_v4 }
 0x384   : > { %912 = vpow2.f32 %v647_v9 }
 0x389   : > { %v911_v5 = vpop.eup %910 }
 0x38a   : > { %v537_v6 = vsel %vm304_vm2, %v911_v5, 0.0 }
 0x38b   : > { %538 = vadd.xlane.f32.xlu0 %v537_v6 }
 0x391   : > { %v913_v10 = vpop.eup %912 }
 0x392   : > { %v649_v11 = vsel %vm304_vm2, %v913_v10, 0.0 }
 0x394   : > { %543 = vrot.lane.b32.xlu1 %v1004_v20, %s931_s28 }
 0x3a1   : > { %431 = vrot.lane.b32.xlu0 %v1004_v20, %s930_s27 }
 0x3b8   : > { %650 = vadd.xlane.f32.xlu1 %v649_v11 }
 0x3c9   : > { %655 = vrot.lane.b32.xlu1 %v1004_v20, %s932_s29 }
 0x40c   : > { %v426_v12 = vpop.xlane.xlu1 %425 }
 0x40d   : > { %914 = vrcp.f32 %v426_v12 }
 0x410   : > { %v544_v18 = vpop.permute.xlu1 %543 }
 0x411   : > { %v549_v21 = vsel %vm320_vm3, %v544_v18, 0 }
 0x414   : > { %v539_v13 = vpop.xlane.xlu0 %538 }
 0x415   : > { %916 = vrcp.f32 %v539_v13 }
 0x418   : > { %v432_v14 = vpop.permute.xlu0 %431 }
 0x419   : > { %v437_v15 = vsel %vm320_vm3, %v432_v14, 0 }
 0x41a   : > { %v915_v16 = vpop.eup %914  ;;  %862 = vmatpush3.bf16.msra.mxu0 %v437_v15 }
 0x41b   : > { %873 = vmatprep.subr.bf16.mxu0 %v928_v0  ;;  %v428_v17 = vmul.f32 %v915_v16, %v909_v3 }
 0x41d   : > { %v429_v19 = vpack.c.bf16 %v428_v17, %v428_v17 }
 0x41f   : > { %864 = vmatmul.mubr.msk.bf16.vlgmr.msra.gmra.mxu0 %vm304_vm2, %v429_v19 }
 0x420   : > { %874 = vmatpush3.bf16.msra.mxu0 %v549_v21  ;;  %875 = vmatprep.mubr.msk.bf16.mxu0 %vm929_vm0, %v928_v0 }
 0x421   : > { %885 = vmatprep.subr.bf16.mxu0 %v928_v0 }
 0x422   : > { %v917_v20 = vpop.eup %916 }
 0x423   : > { %v541_v22 = vmul.f32 %v917_v20, %v911_v5 }
 0x425   : > { %v542_v23 = vpack.c.bf16 %v541_v22, %v541_v22 }
 0x427   : > { %876 = vmatmul.mubr.msk.bf16.vlgmr.msra.gmra.mxu0 %vm304_vm2, %v542_v23 }
 0x428   : > { %887 = vmatprep.mubr.msk.bf16.mxu0 %vm929_vm0, %v928_v0 }
 0x441   : > { %v651_v24 = vpop.xlane.xlu1 %650 }
 0x442   : > { %918 = vrcp.f32 %v651_v24 }
 0x445   : > { %v656_v25 = vpop.permute.xlu1 %655 }
 0x446   : > { %v661_v26 = vsel %vm320_vm3, %v656_v25, 0 }
 0x447   : > { %886 = vmatpush3.bf16.msra.mxu0 %v661_v26 }
 0x44f   : > { %v919_v27 = vpop.eup %918 }
 0x450   : > { %v653_v28 = vmul.f32 %v919_v27, %v913_v10 }
 0x452   : > { %v654_v29 = vpack.c.bf16 %v653_v28, %v653_v28 }
 0x454   : > { %888 = vmatmul.mubr.msk.bf16.vlgmr.msra.gmra.mxu0 %vm304_vm2, %v654_v29 }
 0x4df   : > { %v473_v30 = vpop.f32.mrf.mxu0 }
 0x4e0   : > { %704 = vrot.lane.b32.xlu0 %v473_v30, %s932_s29 }
 0x4e1   : > { %v865_v31 = vpop.f32.mrf.mxu0 }
 0x4e3   : > { %v476_v32 = vpop.f32.mrf.mxu0 }
 0x4e5   : > { %v866_v33 = vpop.f32.mrf.mxu0 }
 0x4e7   : > { %v585_v34 = vpop.f32.mrf.mxu0 }
 0x4e8   : > { %708 = vrot.lane.b32.xlu1 %v585_v34, %s931_s28 }
 0x4e9   : > { %v877_v0 = vpop.f32.mrf.mxu0 }
 0x4eb   : > { %v588_v36 = vpop.f32.mrf.mxu0 }
 0x4ed   : > { %v878_v37 = vpop.f32.mrf.mxu0 }
 0x514   : > { %v697_v38 = vpop.f32.mrf.mxu0 }
 0x515   : > { %712 = vrot.lane.b32.xlu0 %v697_v38, %s930_s27 }
 0x516   : > { %v889_v39 = vpop.f32.mrf.mxu0 }
 0x518   : > { %v700_v40 = vpop.f32.mrf.mxu0 }
 0x51a   : > { %v890_v41 = vpop.f32.mrf.mxu0 }
 0x552   : > { %v705_v42 = vpop.permute.xlu0 %704 }
 0x553   : > { %v715_v44 = vsel %vm255_vm1, %v1025_v35, %v705_v42 }
 0x55a   : > { %v709_v43 = vpop.permute.xlu1 %708 }
 0x55b   : > { %v717_v45 = vsel %vm716_vm4, %v715_v44, %v709_v43 }
 0x587   : > { %v713_v46 = vpop.permute.xlu0 %712 }
 0x588   : > { %v719_v47 = vsel %vm718_vm5, %v717_v45, %v713_v46 }
 0x589   : > { %720 = vst [vmem:[%s240_s9] sm:$0xff] %v719_v47 }
 0x58a PF: > { %s14_s15 = sadd.s32 1, %s926_s15  }
 0x58b   : > { %p11_p4 = scmp.ge.s32.totalorder %s14_s15, 4  }
 0x58d   :  { %13 = sbr.rel (!%p11_p4) target bundleno = 1 (0x1), region = 75 }

</bundles_post_ra>
